<compile_context>
chip_gen: v7x
topology: tpu7x:2x2x1
jax: 0.10.0
libtpu: 0.0.40
codegen_flags: <defaults>
</compile_context>

<pallas_src>
import math

import jax
import jax.numpy as jnp
from jax.experimental import pallas as pl
from jax.experimental.pallas import tpu as pltpu


_INV_SQRT2 = 1.0 / math.sqrt(2.0)


def _gelu_exact(x):
    # PyTorch nn.GELU() default (approximate='none'): 0.5 * x * (1 + erf(x / sqrt(2)))
    # TODO(synk): on v5e, if profiling shows VALU-bound, switch to the tanh approximation
    #             (EUP slot) at the cost of a small numerics deviation from PyTorch.
    return 0.5 * x * (1.0 + jax.lax.erf(x * _INV_SQRT2))


def _cdiv(a, b):
    return -(-a // b)


def _vmem_budget_bytes():
    cap = 64 * 1024 * 1024  # conservative default (v7x per-TC physical)
    try:
        info = pltpu.get_tpu_info()
        cap = int(getattr(info, "vmem_capacity_bytes", cap)) or cap
    except Exception:
        pass
    return int(cap * 0.8)


def attention_pooling_kernel(
    x_ref, mask_ref,
    ln_g_ref, ln_b_ref,
    w1_ref, b1_ref,
    w2_ref, b2_ref,
    w3_ref, b3_ref,
    out_ref, attw_ref,
):
    x = x_ref[...]                          # [TB, S, D] f32
    TB, S, D = x.shape

    # ---- LayerNorm over features (f32, eps = 1e-5, PyTorch default) ----
    mu = jnp.mean(x, axis=-1, keepdims=True)
    var = jnp.mean((x - mu) ** 2, axis=-1, keepdims=True)
    xn = (x - mu) * jax.lax.rsqrt(var + 1e-5)
    xn = xn * ln_g_ref[0] + ln_b_ref[0]

    # ---- attention_net MLP on the flattened [TB*S, D] slab ----
    # bf16 operands on the MXU, f32 accumulation; bias add + GELU in f32.
    xf = xn.reshape(TB * S, D).astype(jnp.bfloat16)
    h = jnp.dot(xf, w1_ref[...], preferred_element_type=jnp.float32) + b1_ref[0]
    h = _gelu_exact(h).astype(jnp.bfloat16)          # drop the live f32 [TB*S, H1] slab
    # Dropout(0.1): no-op at inference time.
    h = jnp.dot(h, w2_ref[...], preferred_element_type=jnp.float32) + b2_ref[0]
    h = _gelu_exact(h)                               # [TB*S, H2] f32
    H2 = h.shape[-1]

    # ---- H2 -> 1 score projection: VPU multiply + lane reduce (no N=1 matmul) ----
    h3 = h.reshape(TB, S, H2)
    s = jnp.sum(h3 * w3_ref[0], axis=-1) + b3_ref[0]     # [TB, S], lane-dense

    # ---- mask fill + softmax over seq (lane axis), f32; exact normalization ----
    s = jnp.where(mask_ref[...] != 0.0, jnp.float32(-1e9), s)
    smax = jnp.max(s, axis=-1, keepdims=True)
    e = jnp.exp(s - smax)
    w = e / jnp.sum(e, axis=-1, keepdims=True)           # rows sum to 1 exactly (f32)

    attw_ref[...] = w                                    # lane-dense store

    # ---- weighted sum over seq on VPU + XLU (no M=1 MXU matmul) ----
    # Re-read x_ref here rather than reusing the value captured before the MLP, so x's
    # live range doesn't span the whole kernel.
    out_ref[...] = jnp.sum(x_ref[...] * w[:, :, None], axis=1)


def attention_pooling(x, mask, params, *, block_b=None, single_buffer_weights=True):
    """x: [B, S, D] f32, mask: [B, S] f32 (nonzero = masked). Returns ([B, D], [B, S])."""
    B, S, D = x.shape
    ln_g, ln_b, w1, b1, w2, b2, w3, b3 = params
    H1, H2 = w1.shape[1], w2.shape[1]

    # Weight prep (wrapper-side layout plumbing): matmul weights in bf16 (native MXU dtype,
    # halved DMA bytes); score projection flattened to a [1, H2] row; scalar bias -> SMEM.
    w1b = w1.astype(jnp.bfloat16)
    w2b = w2.astype(jnp.bfloat16)
    w3r = w3.reshape(1, H2).astype(jnp.float32)
    b3f = b3.reshape(1).astype(jnp.float32)

    # Pad seq to a multiple of 8 so the in-kernel (TB,S,D)<->(TB*S,D) reshapes are free
    # sublane merges/splits; padded positions are fully masked (weight -> 0).
    Sp = 8 * _cdiv(S, 8)
    if Sp != S:
        x = jnp.pad(x, ((0, 0), (0, Sp - S), (0, 0)))
        mask = jnp.pad(mask, ((0, 0), (0, Sp - S)), constant_values=1.0)

    budget = _vmem_budget_bytes()
    f32, bf16 = 4, 2

    def _tile_bytes(tb):
        x_tile = tb * Sp * D * f32
        # double-buffered streamed operands (x, mask) and outputs (pooled, attw)
        stream = 2 * (x_tile + tb * Sp * f32 + tb * D * f32 + tb * Sp * f32)
        # constant operands (weights bf16, LN/bias rows f32), worst case double-buffered
        consts = 2 * ((D * H1 + H1 * H2) * bf16 + (2 * D + H1 + 2 * H2) * f32) + 4096
        # live in-kernel intermediates: x value, xn bf16 slab, h (f32 then bf16), h2 f32, scores
        interm = tb * Sp * (D * (f32 + bf16) + H1 * (f32 + bf16) + H2 * f32 + 4 * f32)
        return stream + consts + interm + (2 << 20)      # slack for compiler scratch

    # Batch-block size: memory-bound regime -> target ~8 MiB per x buffer, multiple of 8.
    B8 = 8 * _cdiv(B, 8)
    if block_b is None:
        x_row_bytes = Sp * D * f32
        block_b = max(8, 8 * _cdiv(_cdiv(8 << 20, x_row_bytes), 8))
        block_b = min(block_b, B8)
        if B8 >= 16:
            # Keep >= 2 grid steps so v7x's two TensorCores both get work on the
            # "parallel" batch axis (near-free on single-TC v5e/v6e).
            block_b = min(block_b, max(8, ((B8 // 2) // 8) * 8))
    else:
        block_b = min(B8, max(8, 8 * _cdiv(block_b, 8)))

    # Shrink until the per-step footprint fits the per-generation VMEM budget.
    while block_b > 8 and _tile_bytes(block_b) > budget:
        block_b = max(8, 8 * _cdiv(block_b // 2, 8))

    tile_bytes = _tile_bytes(block_b)
    vmem_limit = int(min(budget, max(8 << 20, tile_bytes + max(tile_bytes // 4, 2 << 20))))

    grid_b = _cdiv(B, block_b)
    Bp = grid_b * block_b
    if Bp != B:
        x = jnp.pad(x, ((0, Bp - B), (0, 0), (0, 0)))
        mask = jnp.pad(mask, ((0, Bp - B), (0, 0)), constant_values=1.0)

    def const_spec(shape):
        idx = lambda g: (0,) * len(shape)
        if single_buffer_weights:
            # Constant operands: no need to double-buffer them across grid steps.
            return pl.BlockSpec(shape, idx, pipeline_mode=pl.Buffered(1))
        return pl.BlockSpec(shape, idx)

    pooled, attw = pl.pallas_call(
        attention_pooling_kernel,
        out_shape=(
            jax.ShapeDtypeStruct((Bp, D), jnp.float32),
            jax.ShapeDtypeStruct((Bp, Sp), jnp.float32),
        ),
        grid_spec=pltpu.PrefetchScalarGridSpec(
            num_scalar_prefetch=0,
            grid=(grid_b,),
            in_specs=[
                pl.BlockSpec((block_b, Sp, D), lambda g: (g, 0, 0)),   # x
                pl.BlockSpec((block_b, Sp), lambda g: (g, 0)),         # mask
                const_spec((1, D)),     # ln gamma
                const_spec((1, D)),     # ln beta
                const_spec((D, H1)),    # w1 (in, out), bf16
                const_spec((1, H1)),    # b1
                const_spec((H1, H2)),   # w2 (in, out), bf16
                const_spec((1, H2)),    # b2
                const_spec((1, H2)),    # w3 as a row
                pl.BlockSpec(memory_space=pltpu.MemorySpace.SMEM),     # b3 scalar
            ],
            out_specs=[
                pl.BlockSpec((block_b, D), lambda g: (g, 0)),    # pooled output
                pl.BlockSpec((block_b, Sp), lambda g: (g, 0)),   # attention weights
            ],
        ),
        compiler_params=pltpu.CompilerParams(
            dimension_semantics=("parallel",),
            vmem_limit_bytes=vmem_limit,
        ),
    )(x, mask, ln_g, ln_b, w1b, b1, w2b, b2, w3r, b3f)

    return pooled[:B], attw[:B, :S]


def attention_pooling_reference(x, mask, params):
    ln_g, ln_b, w1, b1, w2, b2, w3, b3 = params
    mu = jnp.mean(x, axis=-1, keepdims=True)
    var = jnp.mean((x - mu) ** 2, axis=-1, keepdims=True)
    xn = (x - mu) * jax.lax.rsqrt(var + 1e-5) * ln_g[0] + ln_b[0]
    h = _gelu_exact(xn @ w1 + b1[0])
    h = _gelu_exact(h @ w2 + b2[0])
    s = (h @ w3 + b3[0])[..., 0]           # [B, S]
    s = jnp.where(mask != 0.0, -1e9, s)
    w = jax.nn.softmax(s, axis=1)
    out = jnp.sum(x * w[..., None], axis=1)
    return out, w


def init_params(key, D):
    H1, H2 = D // 2, D // 4
    ks = jax.random.split(key, 6)
    ln_g = jnp.ones((1, D), jnp.float32)
    ln_b = jnp.zeros((1, D), jnp.float32)
    w1 = jax.random.normal(ks[0], (D, H1), jnp.float32) * 0.1
    b1 = jax.random.normal(ks[1], (1, H1), jnp.float32) * 0.01
    w2 = jax.random.normal(ks[2], (H1, H2), jnp.float32) * 0.1
    b2 = jax.random.normal(ks[3], (1, H2), jnp.float32) * 0.01
    w3 = jax.random.normal(ks[4], (H2, 1), jnp.float32) * 0.1
    b3 = jax.random.normal(ks[5], (1, 1), jnp.float32) * 0.01
    return (ln_g, ln_b, w1, b1, w2, b2, w3, b3)


if __name__ == "__main__":
    B, S, D = 2, 8, 32
    key = jax.random.PRNGKey(0)
    kx, kp = jax.random.split(key)

    x = jax.random.normal(kx, (B, S, D), jnp.float32)
    # Padding mask: batch 0 unmasked, batch 1 has last 2 timesteps masked.
    mask = jnp.zeros((B, S), jnp.float32).at[1, -2:].set(1.0)
    params = init_params(kp, D)

    pooled_exp, attw_exp = attention_pooling_reference(x, mask, params)

    def _run(single_buffer_weights):
        p, a = attention_pooling(x, mask, params,
                                 single_buffer_weights=single_buffer_weights)
        jax.block_until_ready((p, a))
        return p, a

    try:
        # Preferred path: constant weights single-buffered (halves their VMEM footprint).
        pooled, attw = _run(True)
    except Exception:
        # Only lowering/compile failures of the single-buffered-constant config land here
        # (no numerics checks inside _run); fall back to default double-buffered constants.
        pooled, attw = _run(False)

    # Numerics check is OUTSIDE the fallback so a real mismatch is never silently retried.
    # bf16 MXU operands => slightly looser tolerance vs. the f32 reference.
    ok = (jnp.allclose(pooled, pooled_exp, atol=1e-2, rtol=1e-2)
          and jnp.allclose(attw, attw_exp, atol=1e-2, rtol=1e-2))
    if not bool(ok):
        raise AssertionError("pallas kernel output mismatch vs reference")

    print("KERNEL_OK")
</pallas_src>

<mosaic_0001>
module attributes {stable_mosaic.version = 11 : i64} {
  func.func @attention_pooling_kernel(%arg0: i32, %arg1: memref<8x8x32xf32, #tpu.memory_space<vmem>>, %arg2: memref<8x8xf32, #tpu.memory_space<vmem>>, %arg3: memref<1x32xf32, #tpu.memory_space<vmem>>, %arg4: memref<1x32xf32, #tpu.memory_space<vmem>>, %arg5: memref<32x16xbf16, #tpu.memory_space<vmem>>, %arg6: memref<1x16xf32, #tpu.memory_space<vmem>>, %arg7: memref<16x8xbf16, #tpu.memory_space<vmem>>, %arg8: memref<1x8xf32, #tpu.memory_space<vmem>>, %arg9: memref<1x8xf32, #tpu.memory_space<vmem>>, %arg10: memref<1xf32, #tpu.memory_space<smem>>, %arg11: memref<8x32xf32, #tpu.memory_space<vmem>>, %arg12: memref<8x8xf32, #tpu.memory_space<vmem>>) attributes {dimension_semantics = [#tpu.dimension_semantics<parallel>], iteration_bounds = array<i64: 1>, scalar_prefetch = 0 : i64, scratch_operands = 0 : i64, tpu.core_type = #tpu.core_type<tc>, window_params = [{transform_indices = @transform_0, window_bounds = array<i64: 8, 8, 32>}, {transform_indices = @transform_1, window_bounds = array<i64: 8, 8>}, {pipeline_mode = #tpu.pipeline_mode<synchronous>, transform_indices = @transform_2, window_bounds = array<i64: 1, 32>}, {pipeline_mode = #tpu.pipeline_mode<synchronous>, transform_indices = @transform_3, window_bounds = array<i64: 1, 32>}, {pipeline_mode = #tpu.pipeline_mode<synchronous>, transform_indices = @transform_4, window_bounds = array<i64: 32, 16>}, {pipeline_mode = #tpu.pipeline_mode<synchronous>, transform_indices = @transform_5, window_bounds = array<i64: 1, 16>}, {pipeline_mode = #tpu.pipeline_mode<synchronous>, transform_indices = @transform_6, window_bounds = array<i64: 16, 8>}, {pipeline_mode = #tpu.pipeline_mode<synchronous>, transform_indices = @transform_7, window_bounds = array<i64: 1, 8>}, {pipeline_mode = #tpu.pipeline_mode<synchronous>, transform_indices = @transform_8, window_bounds = array<i64: 1, 8>}, {transform_indices = @transform_9, window_bounds = array<i64: 1>}, {transform_indices = @transform_10, window_bounds = array<i64: 8, 32>}, {transform_indices = @transform_11, window_bounds = array<i64: 8, 8>}]} {
    %c0 = arith.constant 0 : index
    %c0_0 = arith.constant 0 : index
    %c0_1 = arith.constant 0 : index
    %0 = vector.load %arg1[%c0, %c0_0, %c0_1] : memref<8x8x32xf32, #tpu.memory_space<vmem>>, vector<8x8x32xf32>
    %cst = arith.constant dense<0.000000e+00> : vector<8x8xf32>
    %1 = vector.multi_reduction <add>, %0, %cst [2] : vector<8x8x32xf32> to vector<8x8xf32>
    %2 = vector.shape_cast %1 : vector<8x8xf32> to vector<8x8x1xf32>
    %cst_2 = arith.constant 3.200000e+01 : f32
    %3 = vector.broadcast %cst_2 : f32 to vector<8x8x1xf32>
    %4 = arith.divf %2, %3 : vector<8x8x1xf32>
    %5 = vector.broadcast %4 : vector<8x8x1xf32> to vector<8x8x32xf32>
    %6 = arith.subf %0, %5 : vector<8x8x32xf32>
    %7 = arith.mulf %6, %6 : vector<8x8x32xf32>
    %cst_3 = arith.constant dense<0.000000e+00> : vector<8x8xf32>
    %8 = vector.multi_reduction <add>, %7, %cst_3 [2] : vector<8x8x32xf32> to vector<8x8xf32>
    %9 = vector.shape_cast %8 : vector<8x8xf32> to vector<8x8x1xf32>
    %cst_4 = arith.constant 3.200000e+01 : f32
    %10 = vector.broadcast %cst_4 : f32 to vector<8x8x1xf32>
    %11 = arith.divf %9, %10 : vector<8x8x1xf32>
    %12 = vector.broadcast %4 : vector<8x8x1xf32> to vector<8x8x32xf32>
    %13 = arith.subf %0, %12 : vector<8x8x32xf32>
    %cst_5 = arith.constant 9.99999974E-6 : f32
    %14 = vector.broadcast %cst_5 : f32 to vector<8x8x1xf32>
    %15 = arith.addf %11, %14 : vector<8x8x1xf32>
    %16 = math.rsqrt %15 : vector<8x8x1xf32>
    %17 = vector.broadcast %16 : vector<8x8x1xf32> to vector<8x8x32xf32>
    %18 = arith.mulf %13, %17 : vector<8x8x32xf32>
    %c0_6 = arith.constant 0 : index
    %c0_7 = arith.constant 0 : index
    %19 = vector.load %arg3[%c0_6, %c0_7] : memref<1x32xf32, #tpu.memory_space<vmem>>, vector<1x32xf32>
    %20 = vector.shape_cast %19 : vector<1x32xf32> to vector<32xf32>
    %21 = vector.shape_cast %20 : vector<32xf32> to vector<1x1x32xf32>
    %22 = vector.broadcast %21 : vector<1x1x32xf32> to vector<8x8x32xf32>
    %23 = arith.mulf %18, %22 : vector<8x8x32xf32>
    %c0_8 = arith.constant 0 : index
    %c0_9 = arith.constant 0 : index
    %24 = vector.load %arg4[%c0_8, %c0_9] : memref<1x32xf32, #tpu.memory_space<vmem>>, vector<1x32xf32>
    %25 = vector.shape_cast %24 : vector<1x32xf32> to vector<32xf32>
    %26 = vector.shape_cast %25 : vector<32xf32> to vector<1x1x32xf32>
    %27 = vector.broadcast %26 : vector<1x1x32xf32> to vector<8x8x32xf32>
    %28 = arith.addf %23, %27 : vector<8x8x32xf32>
    %29 = vector.shape_cast %28 : vector<8x8x32xf32> to vector<64x32xf32>
    %30 = arith.truncf %29 : vector<64x32xf32> to vector<64x32xbf16>
    %c0_10 = arith.constant 0 : index
    %c0_11 = arith.constant 0 : index
    %31 = vector.load %arg5[%c0_10, %c0_11] : memref<32x16xbf16, #tpu.memory_space<vmem>>, vector<32x16xbf16>
    %cst_12 = arith.constant dense<0.000000e+00> : vector<64x16xf32>
    %32 = tpu.matmul %30, %31, %cst_12 {dimension_numbers = #tpu.dot_dimension_numbers<[1], [0], [0], [1], [0, 0, 1, 1], [], []>} : vector<64x32xbf16>, vector<32x16xbf16>, vector<64x16xf32> -> vector<64x16xf32>
    %c0_13 = arith.constant 0 : index
    %c0_14 = arith.constant 0 : index
    %33 = vector.load %arg6[%c0_13, %c0_14] : memref<1x16xf32, #tpu.memory_space<vmem>>, vector<1x16xf32>
    %34 = vector.shape_cast %33 : vector<1x16xf32> to vector<16xf32>
    %35 = vector.shape_cast %34 : vector<16xf32> to vector<1x16xf32>
    %36 = vector.broadcast %35 : vector<1x16xf32> to vector<64x16xf32>
    %37 = arith.addf %32, %36 : vector<64x16xf32>
    %cst_15 = arith.constant 5.000000e-01 : f32
    %38 = vector.broadcast %cst_15 : f32 to vector<64x16xf32>
    %39 = arith.mulf %38, %37 : vector<64x16xf32>
    %cst_16 = arith.constant 0.707106769 : f32
    %40 = vector.broadcast %cst_16 : f32 to vector<64x16xf32>
    %41 = arith.mulf %37, %40 : vector<64x16xf32>
    %42 = math.erf %41 : vector<64x16xf32>
    %cst_17 = arith.constant 1.000000e+00 : f32
    %43 = vector.broadcast %cst_17 : f32 to vector<64x16xf32>
    %44 = arith.addf %43, %42 : vector<64x16xf32>
    %45 = arith.mulf %39, %44 : vector<64x16xf32>
    %46 = arith.truncf %45 : vector<64x16xf32> to vector<64x16xbf16>
    %c0_18 = arith.constant 0 : index
    %c0_19 = arith.constant 0 : index
    %47 = vector.load %arg7[%c0_18, %c0_19] : memref<16x8xbf16, #tpu.memory_space<vmem>>, vector<16x8xbf16>
    %cst_20 = arith.constant dense<0.000000e+00> : vector<64x8xf32>
    %48 = tpu.matmul %46, %47, %cst_20 {dimension_numbers = #tpu.dot_dimension_numbers<[1], [0], [0], [1], [0, 0, 1, 1], [], []>} : vector<64x16xbf16>, vector<16x8xbf16>, vector<64x8xf32> -> vector<64x8xf32>
    %c0_21 = arith.constant 0 : index
    %c0_22 = arith.constant 0 : index
    %49 = vector.load %arg8[%c0_21, %c0_22] : memref<1x8xf32, #tpu.memory_space<vmem>>, vector<1x8xf32>
    %50 = vector.shape_cast %49 : vector<1x8xf32> to vector<8xf32>
    %51 = vector.shape_cast %50 : vector<8xf32> to vector<1x8xf32>
    %52 = vector.broadcast %51 : vector<1x8xf32> to vector<64x8xf32>
    %53 = arith.addf %48, %52 : vector<64x8xf32>
    %cst_23 = arith.constant 5.000000e-01 : f32
    %54 = vector.broadcast %cst_23 : f32 to vector<64x8xf32>
    %55 = arith.mulf %54, %53 : vector<64x8xf32>
    %cst_24 = arith.constant 0.707106769 : f32
    %56 = vector.broadcast %cst_24 : f32 to vector<64x8xf32>
    %57 = arith.mulf %53, %56 : vector<64x8xf32>
    %58 = math.erf %57 : vector<64x8xf32>
    %cst_25 = arith.constant 1.000000e+00 : f32
    %59 = vector.broadcast %cst_25 : f32 to vector<64x8xf32>
    %60 = arith.addf %59, %58 : vector<64x8xf32>
    %61 = arith.mulf %55, %60 : vector<64x8xf32>
    %62 = vector.shape_cast %61 : vector<64x8xf32> to vector<8x8x8xf32>
    %c0_26 = arith.constant 0 : index
    %c0_27 = arith.constant 0 : index
    %63 = vector.load %arg9[%c0_26, %c0_27] : memref<1x8xf32, #tpu.memory_space<vmem>>, vector<1x8xf32>
    %64 = vector.shape_cast %63 : vector<1x8xf32> to vector<8xf32>
    %65 = vector.shape_cast %64 : vector<8xf32> to vector<1x1x8xf32>
    %66 = vector.broadcast %65 : vector<1x1x8xf32> to vector<8x8x8xf32>
    %67 = arith.mulf %62, %66 : vector<8x8x8xf32>
    %cst_28 = arith.constant dense<0.000000e+00> : vector<8x8xf32>
    %68 = vector.multi_reduction <add>, %67, %cst_28 [2] : vector<8x8x8xf32> to vector<8x8xf32>
    %c0_29 = arith.constant 0 : index
    %69 = memref.load %arg10[%c0_29] : memref<1xf32, #tpu.memory_space<smem>>
    %70 = vector.broadcast %69 : f32 to vector<8x8xf32>
    %71 = arith.addf %68, %70 : vector<8x8xf32>
    %c0_30 = arith.constant 0 : index
    %c0_31 = arith.constant 0 : index
    %72 = vector.load %arg2[%c0_30, %c0_31] : memref<8x8xf32, #tpu.memory_space<vmem>>, vector<8x8xf32>
    %cst_32 = arith.constant 0.000000e+00 : f32
    %73 = vector.broadcast %cst_32 : f32 to vector<8x8xf32>
    %74 = arith.cmpf one, %72, %73 : vector<8x8xf32>
    %cst_33 = arith.constant -1.000000e+09 : f32
    %75 = vector.broadcast %cst_33 : f32 to vector<8x8xf32>
    %76 = arith.select %74, %75, %71 : vector<8x8xi1>, vector<8x8xf32>
    %cst_34 = arith.constant dense<0xFF800000> : vector<8xf32>
    %77 = vector.multi_reduction <maximumf>, %76, %cst_34 [1] : vector<8x8xf32> to vector<8xf32>
    %78 = vector.shape_cast %77 : vector<8xf32> to vector<8x1xf32>
    %79 = vector.broadcast %78 : vector<8x1xf32> to vector<8x8xf32>
    %80 = arith.subf %76, %79 : vector<8x8xf32>
    %81 = math.exp %80 : vector<8x8xf32>
    %cst_35 = arith.constant dense<0.000000e+00> : vector<8xf32>
    %82 = vector.multi_reduction <add>, %81, %cst_35 [1] : vector<8x8xf32> to vector<8xf32>
    %83 = vector.shape_cast %82 : vector<8xf32> to vector<8x1xf32>
    %84 = vector.broadcast %83 : vector<8x1xf32> to vector<8x8xf32>
    %85 = arith.divf %81, %84 : vector<8x8xf32>
    %c0_36 = arith.constant 0 : index
    %c0_37 = arith.constant 0 : index
    %86 = vector.load %arg12[%c0_36, %c0_37] : memref<8x8xf32, #tpu.memory_space<vmem>>, vector<8x8xf32>
    tpu.vector_store %arg12[%c0_36, %c0_37], %85 {strides = array<i32>} : memref<8x8xf32, #tpu.memory_space<vmem>>, vector<8x8xf32>,
    %c0_38 = arith.constant 0 : index
    %c0_39 = arith.constant 0 : index
    %c0_40 = arith.constant 0 : index
    %87 = vector.load %arg1[%c0_38, %c0_39, %c0_40] : memref<8x8x32xf32, #tpu.memory_space<vmem>>, vector<8x8x32xf32>
    %88 = vector.shape_cast %85 : vector<8x8xf32> to vector<8x8x1xf32>
    %89 = vector.broadcast %88 : vector<8x8x1xf32> to vector<8x8x32xf32>
    %90 = arith.mulf %87, %89 : vector<8x8x32xf32>
    %cst_41 = arith.constant dense<0.000000e+00> : vector<8x32xf32>
    %91 = vector.multi_reduction <add>, %90, %cst_41 [1] : vector<8x8x32xf32> to vector<8x32xf32>
    %c0_42 = arith.constant 0 : index
    %c0_43 = arith.constant 0 : index
    %92 = vector.load %arg11[%c0_42, %c0_43] : memref<8x32xf32, #tpu.memory_space<vmem>>, vector<8x32xf32>
    tpu.vector_store %arg11[%c0_42, %c0_43], %91 {strides = array<i32>} : memref<8x32xf32, #tpu.memory_space<vmem>>, vector<8x32xf32>,
    return
  }
  func.func @transform_0(%arg0: i32) -> (i32, i32, i32) {
    %c0_i32 = arith.constant 0 : i32
    %c0_i32_0 = arith.constant 0 : i32
    %c0_i32_1 = arith.constant 0 : i32
    return %arg0, %c0_i32, %c0_i32_0 : i32, i32, i32
  }
  func.func @transform_1(%arg0: i32) -> (i32, i32) {
    %c0_i32 = arith.constant 0 : i32
    %c0_i32_0 = arith.constant 0 : i32
    return %arg0, %c0_i32 : i32, i32
  }
  func.func @transform_2(%arg0: i32) -> (i32, i32) {
    %c0_i32 = arith.constant 0 : i32
    %c0_i32_0 = arith.constant 0 : i32
    %c0_i32_1 = arith.constant 0 : i32
    return %c0_i32, %c0_i32_0 : i32, i32
  }
  func.func @transform_3(%arg0: i32) -> (i32, i32) {
    %c0_i32 = arith.constant 0 : i32
    %c0_i32_0 = arith.constant 0 : i32
    %c0_i32_1 = arith.constant 0 : i32
    return %c0_i32, %c0_i32_0 : i32, i32
  }
  func.func @transform_4(%arg0: i32) -> (i32, i32) {
    %c0_i32 = arith.constant 0 : i32
    %c0_i32_0 = arith.constant 0 : i32
    %c0_i32_1 = arith.constant 0 : i32
    return %c0_i32, %c0_i32_0 : i32, i32
  }
  func.func @transform_5(%arg0: i32) -> (i32, i32) {
    %c0_i32 = arith.constant 0 : i32
    %c0_i32_0 = arith.constant 0 : i32
    %c0_i32_1 = arith.constant 0 : i32
    return %c0_i32, %c0_i32_0 : i32, i32
  }
  func.func @transform_6(%arg0: i32) -> (i32, i32) {
    %c0_i32 = arith.constant 0 : i32
    %c0_i32_0 = arith.constant 0 : i32
    %c0_i32_1 = arith.constant 0 : i32
    return %c0_i32, %c0_i32_0 : i32, i32
  }
  func.func @transform_7(%arg0: i32) -> (i32, i32) {
    %c0_i32 = arith.constant 0 : i32
    %c0_i32_0 = arith.constant 0 : i32
    %c0_i32_1 = arith.constant 0 : i32
    return %c0_i32, %c0_i32_0 : i32, i32
  }
  func.func @transform_8(%arg0: i32) -> (i32, i32) {
    %c0_i32 = arith.constant 0 : i32
    %c0_i32_0 = arith.constant 0 : i32
    %c0_i32_1 = arith.constant 0 : i32
    return %c0_i32, %c0_i32_0 : i32, i32
  }
  func.func @transform_9(%arg0: i32) -> i32 {
    %c0_i32 = arith.constant 0 : i32
    %c0_i32_0 = arith.constant 0 : i32
    return %c0_i32 : i32
  }
  func.func @transform_10(%arg0: i32) -> (i32, i32) {
    %c0_i32 = arith.constant 0 : i32
    %c0_i32_0 = arith.constant 0 : i32
    return %arg0, %c0_i32 : i32, i32
  }
  func.func @transform_11(%arg0: i32) -> (i32, i32) {
    %c0_i32 = arith.constant 0 : i32
    %c0_i32_0 = arith.constant 0 : i32
    return %arg0, %c0_i32 : i32, i32
  }
}

module attributes {stable_mosaic.version = 11 : i64} {
  func.func @attention_pooling_kernel(%arg0: i32, %arg1: memref<8x8x32xf32, #tpu.memory_space<vmem>>, %arg2: memref<8x8xf32, #tpu.memory_space<vmem>>, %arg3: memref<1x32xf32, #tpu.memory_space<vmem>>, %arg4: memref<1x32xf32, #tpu.memory_space<vmem>>, %arg5: memref<32x16xbf16, #tpu.memory_space<vmem>>, %arg6: memref<1x16xf32, #tpu.memory_space<vmem>>, %arg7: memref<16x8xbf16, #tpu.memory_space<vmem>>, %arg8: memref<1x8xf32, #tpu.memory_space<vmem>>, %arg9: memref<1x8xf32, #tpu.memory_space<vmem>>, %arg10: memref<1xf32, #tpu.memory_space<smem>>, %arg11: memref<8x32xf32, #tpu.memory_space<vmem>>, %arg12: memref<8x8xf32, #tpu.memory_space<vmem>>) attributes {dimension_semantics = [#tpu.dimension_semantics<parallel>], iteration_bounds = array<i64: 1>, scalar_prefetch = 0 : i64, scratch_operands = 0 : i64, tpu.core_type = #tpu.core_type<tc>, window_params = [{transform_indices = @transform_0, window_bounds = array<i64: 8, 8, 32>}, {transform_indices = @transform_1, window_bounds = array<i64: 8, 8>}, {pipeline_mode = #tpu.pipeline_mode<synchronous>, transform_indices = @transform_2, window_bounds = array<i64: 1, 32>}, {pipeline_mode = #tpu.pipeline_mode<synchronous>, transform_indices = @transform_3, window_bounds = array<i64: 1, 32>}, {pipeline_mode = #tpu.pipeline_mode<synchronous>, transform_indices = @transform_4, window_bounds = array<i64: 32, 16>}, {pipeline_mode = #tpu.pipeline_mode<synchronous>, transform_indices = @transform_5, window_bounds = array<i64: 1, 16>}, {pipeline_mode = #tpu.pipeline_mode<synchronous>, transform_indices = @transform_6, window_bounds = array<i64: 16, 8>}, {pipeline_mode = #tpu.pipeline_mode<synchronous>, transform_indices = @transform_7, window_bounds = array<i64: 1, 8>}, {pipeline_mode = #tpu.pipeline_mode<synchronous>, transform_indices = @transform_8, window_bounds = array<i64: 1, 8>}, {transform_indices = @transform_9, window_bounds = array<i64: 1>}, {transform_indices = @transform_10, window_bounds = array<i64: 8, 32>}, {transform_indices = @transform_11, window_bounds = array<i64: 8, 8>}]} {
    %c0 = arith.constant 0 : index
    %c0_0 = arith.constant 0 : index
    %c0_1 = arith.constant 0 : index
    %0 = vector.load %arg1[%c0, %c0_0, %c0_1] : memref<8x8x32xf32, #tpu.memory_space<vmem>>, vector<8x8x32xf32>
    %cst = arith.constant dense<0.000000e+00> : vector<8x8xf32>
    %1 = vector.multi_reduction <add>, %0, %cst [2] : vector<8x8x32xf32> to vector<8x8xf32>
    %2 = vector.shape_cast %1 : vector<8x8xf32> to vector<8x8x1xf32>
    %cst_2 = arith.constant 3.200000e+01 : f32
    %3 = vector.broadcast %cst_2 : f32 to vector<8x8x1xf32>
    %4 = arith.divf %2, %3 : vector<8x8x1xf32>
    %5 = vector.broadcast %4 : vector<8x8x1xf32> to vector<8x8x32xf32>
    %6 = arith.subf %0, %5 : vector<8x8x32xf32>
    %7 = arith.mulf %6, %6 : vector<8x8x32xf32>
    %cst_3 = arith.constant dense<0.000000e+00> : vector<8x8xf32>
    %8 = vector.multi_reduction <add>, %7, %cst_3 [2] : vector<8x8x32xf32> to vector<8x8xf32>
    %9 = vector.shape_cast %8 : vector<8x8xf32> to vector<8x8x1xf32>
    %cst_4 = arith.constant 3.200000e+01 : f32
    %10 = vector.broadcast %cst_4 : f32 to vector<8x8x1xf32>
    %11 = arith.divf %9, %10 : vector<8x8x1xf32>
    %12 = vector.broadcast %4 : vector<8x8x1xf32> to vector<8x8x32xf32>
    %13 = arith.subf %0, %12 : vector<8x8x32xf32>
    %cst_5 = arith.constant 9.99999974E-6 : f32
    %14 = vector.broadcast %cst_5 : f32 to vector<8x8x1xf32>
    %15 = arith.addf %11, %14 : vector<8x8x1xf32>
    %16 = math.rsqrt %15 : vector<8x8x1xf32>
    %17 = vector.broadcast %16 : vector<8x8x1xf32> to vector<8x8x32xf32>
    %18 = arith.mulf %13, %17 : vector<8x8x32xf32>
    %c0_6 = arith.constant 0 : index
    %c0_7 = arith.constant 0 : index
    %19 = vector.load %arg3[%c0_6, %c0_7] : memref<1x32xf32, #tpu.memory_space<vmem>>, vector<1x32xf32>
    %20 = vector.shape_cast %19 : vector<1x32xf32> to vector<32xf32>
    %21 = vector.shape_cast %20 : vector<32xf32> to vector<1x1x32xf32>
    %22 = vector.broadcast %21 : vector<1x1x32xf32> to vector<8x8x32xf32>
    %23 = arith.mulf %18, %22 : vector<8x8x32xf32>
    %c0_8 = arith.constant 0 : index
    %c0_9 = arith.constant 0 : index
    %24 = vector.load %arg4[%c0_8, %c0_9] : memref<1x32xf32, #tpu.memory_space<vmem>>, vector<1x32xf32>
    %25 = vector.shape_cast %24 : vector<1x32xf32> to vector<32xf32>
    %26 = vector.shape_cast %25 : vector<32xf32> to vector<1x1x32xf32>
    %27 = vector.broadcast %26 : vector<1x1x32xf32> to vector<8x8x32xf32>
    %28 = arith.addf %23, %27 : vector<8x8x32xf32>
    %29 = vector.shape_cast %28 : vector<8x8x32xf32> to vector<64x32xf32>
    %30 = arith.truncf %29 : vector<64x32xf32> to vector<64x32xbf16>
    %c0_10 = arith.constant 0 : index
    %c0_11 = arith.constant 0 : index
    %31 = vector.load %arg5[%c0_10, %c0_11] : memref<32x16xbf16, #tpu.memory_space<vmem>>, vector<32x16xbf16>
    %cst_12 = arith.constant dense<0.000000e+00> : vector<64x16xf32>
    %32 = tpu.matmul %30, %31, %cst_12 {dimension_numbers = #tpu.dot_dimension_numbers<[1], [0], [0], [1], [0, 0, 1, 1], [], []>} : vector<64x32xbf16>, vector<32x16xbf16>, vector<64x16xf32> -> vector<64x16xf32>
    %c0_13 = arith.constant 0 : index
    %c0_14 = arith.constant 0 : index
    %33 = vector.load %arg6[%c0_13, %c0_14] : memref<1x16xf32, #tpu.memory_space<vmem>>, vector<1x16xf32>
    %34 = vector.shape_cast %33 : vector<1x16xf32> to vector<16xf32>
    %35 = vector.shape_cast %34 : vector<16xf32> to vector<1x16xf32>
    %36 = vector.broadcast %35 : vector<1x16xf32> to vector<64x16xf32>
    %37 = arith.addf %32, %36 : vector<64x16xf32>
    %cst_15 = arith.constant 5.000000e-01 : f32
    %38 = vector.broadcast %cst_15 : f32 to vector<64x16xf32>
    %39 = arith.mulf %38, %37 : vector<64x16xf32>
    %cst_16 = arith.constant 0.707106769 : f32
    %40 = vector.broadcast %cst_16 : f32 to vector<64x16xf32>
    %41 = arith.mulf %37, %40 : vector<64x16xf32>
    %42 = math.erf %41 : vector<64x16xf32>
    %cst_17 = arith.constant 1.000000e+00 : f32
    %43 = vector.broadcast %cst_17 : f32 to vector<64x16xf32>
    %44 = arith.addf %43, %42 : vector<64x16xf32>
    %45 = arith.mulf %39, %44 : vector<64x16xf32>
    %46 = arith.truncf %45 : vector<64x16xf32> to vector<64x16xbf16>
    %c0_18 = arith.constant 0 : index
    %c0_19 = arith.constant 0 : index
    %47 = vector.load %arg7[%c0_18, %c0_19] : memref<16x8xbf16, #tpu.memory_space<vmem>>, vector<16x8xbf16>
    %cst_20 = arith.constant dense<0.000000e+00> : vector<64x8xf32>
    %48 = tpu.matmul %46, %47, %cst_20 {dimension_numbers = #tpu.dot_dimension_numbers<[1], [0], [0], [1], [0, 0, 1, 1], [], []>} : vector<64x16xbf16>, vector<16x8xbf16>, vector<64x8xf32> -> vector<64x8xf32>
    %c0_21 = arith.constant 0 : index
    %c0_22 = arith.constant 0 : index
    %49 = vector.load %arg8[%c0_21, %c0_22] : memref<1x8xf32, #tpu.memory_space<vmem>>, vector<1x8xf32>
    %50 = vector.shape_cast %49 : vector<1x8xf32> to vector<8xf32>
    %51 = vector.shape_cast %50 : vector<8xf32> to vector<1x8xf32>
    %52 = vector.broadcast %51 : vector<1x8xf32> to vector<64x8xf32>
    %53 = arith.addf %48, %52 : vector<64x8xf32>
    %cst_23 = arith.constant 5.000000e-01 : f32
    %54 = vector.broadcast %cst_23 : f32 to vector<64x8xf32>
    %55 = arith.mulf %54, %53 : vector<64x8xf32>
    %cst_24 = arith.constant 0.707106769 : f32
    %56 = vector.broadcast %cst_24 : f32 to vector<64x8xf32>
    %57 = arith.mulf %53, %56 : vector<64x8xf32>
    %58 = math.erf %57 : vector<64x8xf32>
    %cst_25 = arith.constant 1.000000e+00 : f32
    %59 = vector.broadcast %cst_25 : f32 to vector<64x8xf32>
    %60 = arith.addf %59, %58 : vector<64x8xf32>
    %61 = arith.mulf %55, %60 : vector<64x8xf32>
    %62 = vector.shape_cast %61 : vector<64x8xf32> to vector<8x8x8xf32>
    %c0_26 = arith.constant 0 : index
    %c0_27 = arith.constant 0 : index
    %63 = vector.load %arg9[%c0_26, %c0_27] : memref<1x8xf32, #tpu.memory_space<vmem>>, vector<1x8xf32>
    %64 = vector.shape_cast %63 : vector<1x8xf32> to vector<8xf32>
    %65 = vector.shape_cast %64 : vector<8xf32> to vector<1x1x8xf32>
    %66 = vector.broadcast %65 : vector<1x1x8xf32> to vector<8x8x8xf32>
    %67 = arith.mulf %62, %66 : vector<8x8x8xf32>
    %cst_28 = arith.constant dense<0.000000e+00> : vector<8x8xf32>
    %68 = vector.multi_reduction <add>, %67, %cst_28 [2] : vector<8x8x8xf32> to vector<8x8xf32>
    %c0_29 = arith.constant 0 : index
    %69 = memref.load %arg10[%c0_29] : memref<1xf32, #tpu.memory_space<smem>>
    %70 = vector.broadcast %69 : f32 to vector<8x8xf32>
    %71 = arith.addf %68, %70 : vector<8x8xf32>
    %c0_30 = arith.constant 0 : index
    %c0_31 = arith.constant 0 : index
    %72 = vector.load %arg2[%c0_30, %c0_31] : memref<8x8xf32, #tpu.memory_space<vmem>>, vector<8x8xf32>
    %cst_32 = arith.constant 0.000000e+00 : f32
    %73 = vector.broadcast %cst_32 : f32 to vector<8x8xf32>
    %74 = arith.cmpf one, %72, %73 : vector<8x8xf32>
    %cst_33 = arith.constant -1.000000e+09 : f32
    %75 = vector.broadcast %cst_33 : f32 to vector<8x8xf32>
    %76 = arith.select %74, %75, %71 : vector<8x8xi1>, vector<8x8xf32>
    %cst_34 = arith.constant dense<0xFF800000> : vector<8xf32>
    %77 = vector.multi_reduction <maximumf>, %76, %cst_34 [1] : vector<8x8xf32> to vector<8xf32>
    %78 = vector.shape_cast %77 : vector<8xf32> to vector<8x1xf32>
    %79 = vector.broadcast %78 : vector<8x1xf32> to vector<8x8xf32>
    %80 = arith.subf %76, %79 : vector<8x8xf32>
    %81 = math.exp %80 : vector<8x8xf32>
    %cst_35 = arith.constant dense<0.000000e+00> : vector<8xf32>
    %82 = vector.multi_reduction <add>, %81, %cst_35 [1] : vector<8x8xf32> to vector<8xf32>
    %83 = vector.shape_cast %82 : vector<8xf32> to vector<8x1xf32>
    %84 = vector.broadcast %83 : vector<8x1xf32> to vector<8x8xf32>
    %85 = arith.divf %81, %84 : vector<8x8xf32>
    %c0_36 = arith.constant 0 : index
    %c0_37 = arith.constant 0 : index
    %86 = vector.load %arg12[%c0_36, %c0_37] : memref<8x8xf32, #tpu.memory_space<vmem>>, vector<8x8xf32>
    tpu.vector_store %arg12[%c0_36, %c0_37], %85 {strides = array<i32>} : memref<8x8xf32, #tpu.memory_space<vmem>>, vector<8x8xf32>,
    %c0_38 = arith.constant 0 : index
    %c0_39 = arith.constant 0 : index
    %c0_40 = arith.constant 0 : index
    %87 = vector.load %arg1[%c0_38, %c0_39, %c0_40] : memref<8x8x32xf32, #tpu.memory_space<vmem>>, vector<8x8x32xf32>
    %88 = vector.shape_cast %85 : vector<8x8xf32> to vector<8x8x1xf32>
    %89 = vector.broadcast %88 : vector<8x8x1xf32> to vector<8x8x32xf32>
    %90 = arith.mulf %87, %89 : vector<8x8x32xf32>
    %cst_41 = arith.constant dense<0.000000e+00> : vector<8x32xf32>
    %91 = vector.multi_reduction <add>, %90, %cst_41 [1] : vector<8x8x32xf32> to vector<8x32xf32>
    %c0_42 = arith.constant 0 : index
    %c0_43 = arith.constant 0 : index
    %92 = vector.load %arg11[%c0_42, %c0_43] : memref<8x32xf32, #tpu.memory_space<vmem>>, vector<8x32xf32>
    tpu.vector_store %arg11[%c0_42, %c0_43], %91 {strides = array<i32>} : memref<8x32xf32, #tpu.memory_space<vmem>>, vector<8x32xf32>,
    return
  }
  func.func @transform_0(%arg0: i32) -> (i32, i32, i32) {
    %c0_i32 = arith.constant 0 : i32
    %c0_i32_0 = arith.constant 0 : i32
    %c0_i32_1 = arith.constant 0 : i32
    return %arg0, %c0_i32, %c0_i32_0 : i32, i32, i32
  }
  func.func @transform_1(%arg0: i32) -> (i32, i32) {
    %c0_i32 = arith.constant 0 : i32
    %c0_i32_0 = arith.constant 0 : i32
    return %arg0, %c0_i32 : i32, i32
  }
  func.func @transform_2(%arg0: i32) -> (i32, i32) {
    %c0_i32 = arith.constant 0 : i32
    %c0_i32_0 = arith.constant 0 : i32
    %c0_i32_1 = arith.constant 0 : i32
    return %c0_i32, %c0_i32_0 : i32, i32
  }
  func.func @transform_3(%arg0: i32) -> (i32, i32) {
    %c0_i32 = arith.constant 0 : i32
    %c0_i32_0 = arith.constant 0 : i32
    %c0_i32_1 = arith.constant 0 : i32
    return %c0_i32, %c0_i32_0 : i32, i32
  }
  func.func @transform_4(%arg0: i32) -> (i32, i32) {
    %c0_i32 = arith.constant 0 : i32
    %c0_i32_0 = arith.constant 0 : i32
    %c0_i32_1 = arith.constant 0 : i32
    return %c0_i32, %c0_i32_0 : i32, i32
  }
  func.func @transform_5(%arg0: i32) -> (i32, i32) {
    %c0_i32 = arith.constant 0 : i32
    %c0_i32_0 = arith.constant 0 : i32
    %c0_i32_1 = arith.constant 0 : i32
    return %c0_i32, %c0_i32_0 : i32, i32
  }
  func.func @transform_6(%arg0: i32) -> (i32, i32) {
    %c0_i32 = arith.constant 0 : i32
    %c0_i32_0 = arith.constant 0 : i32
    %c0_i32_1 = arith.constant 0 : i32
    return %c0_i32, %c0_i32_0 : i32, i32
  }
  func.func @transform_7(%arg0: i32) -> (i32, i32) {
    %c0_i32 = arith.constant 0 : i32
    %c0_i32_0 = arith.constant 0 : i32
    %c0_i32_1 = arith.constant 0 : i32
    return %c0_i32, %c0_i32_0 : i32, i32
  }
  func.func @transform_8(%arg0: i32) -> (i32, i32) {
    %c0_i32 = arith.constant 0 : i32
    %c0_i32_0 = arith.constant 0 : i32
    %c0_i32_1 = arith.constant 0 : i32
    return %c0_i32, %c0_i32_0 : i32, i32
  }
  func.func @transform_9(%arg0: i32) -> i32 {
    %c0_i32 = arith.constant 0 : i32
    %c0_i32_0 = arith.constant 0 : i32
    return %c0_i32 : i32
  }
  func.func @transform_10(%arg0: i32) -> (i32, i32) {
    %c0_i32 = arith.constant 0 : i32
    %c0_i32_0 = arith.constant 0 : i32
    return %arg0, %c0_i32 : i32, i32
  }
  func.func @transform_11(%arg0: i32) -> (i32, i32) {
    %c0_i32 = arith.constant 0 : i32
    %c0_i32_0 = arith.constant 0 : i32
    return %arg0, %c0_i32 : i32, i32
  }
}

</mosaic_0001>

<bundles_post_ra>
// kernel: tpu_custom_call.1
= control target key start
LH: loop header
LB: loop body
LE: loop exit
PB: predicated region body
PF: predicated region fallthrough
CT: control target
= control target key end

     0   :  { %18 = vsyncpa [#allocation4], 0  ;;  %s1237_s0 = inlined_call_operand.hbm [shape: f32[8,8,32], index: 0, kind: input, shape index: {}]   ;;  %s1238_s1 = inlined_call_operand.vmem [shape: f32[8,8], index: 1, kind: input, shape index: {}]   ;;  %s1239_s2 = inlined_call_operand.vmem [shape: f32[1,32], index: 2, kind: input, shape index: {}]   ;;  %s1240_s3 = inlined_call_operand.vmem [shape: f32[1,32], index: 3, kind: input, shape index: {}]   ;;  %s1241_s4 = inlined_call_operand.vmem [shape: bf16[32,16], index: 4, kind: input, shape index: {}]   ;;  %s1242_s5 = inlined_call_operand.vmem [shape: f32[1,16], index: 5, kind: input, shape index: {}]   ;;  %s1243_s6 = inlined_call_operand.vmem [shape: bf16[16,8], index: 6, kind: input, shape index: {}]   ;;  %s1244_s7 = inlined_call_operand.vmem [shape: f32[1,8], index: 7, kind: input, shape index: {}]   ;;  %s1245_s8 = inlined_call_operand.vmem [shape: f32[1,8], index: 8, kind: input, shape index: {}]   ;;  %s1246_s9 = inlined_call_operand.<no memory space> [shape: f32[1], index: 9, kind: input, shape index: {}]   ;;  %s1247_s10 = inlined_call_operand.hbm [shape: f32[8,32], index: 10, kind: output, shape index: {0}]   ;;  %s1248_s11 = inlined_call_operand.hbm [shape: f32[8,8], index: 11, kind: output, shape index: {1}]  }
   0x1   :  { %19 = vsyncpa [#allocation5], 0 }
   0x2   :  { %20 = vsyncpa [#allocation8], 0  ;;  %s957_s17 = smov [#allocation3]   ;;  %s885_s21 = scalar_lea.hbm %s1237_s0, 1024 }
   0x3   :  { %s26_s18 = sshll.u32 %s957_s17, 4  ;;  %p886_p0 = scmp.ne.s32.totalorder %s1237_s0, %s885_s21  ;;  %s27_s18 = int_to_ptr.vmem [resolvable:$true] %s26_s18 }
   0x4   :  { %p889_p1 = scmp.lt.u32.totalorder %s885_s21, %s1237_s0 }
   0x6   :  { %p891_p2 = pnand %p889_p1, %p886_p0 }
   0x8   :  { %894 = shalt.err (!%p891_p2)
}
   0x9   :  { %s895_s26 = scalar_lea.vmem %s27_s18, 1024  ;;  %p900_p4 = scmp.lt.s32.totalorder %s27_s18, %s27_s18 }
   0xa   :  { %p896_p3 = scmp.ne.s32.totalorder %s27_s18, %s895_s26  ;;  %p901_p5 = scmp.lt.s32.totalorder %s895_s26, %s895_s26 }
   0xc   :  { %p902_p6 = por %p901_p5, %p900_p4 }
   0xe   :  { %p903_p7 = pnand %p902_p6, %p896_p3 }
  0x10   :  { %906 = shalt.err (!%p903_p7)
}
  0x11   :  { %s958_s27 = smov 128   ;;  %s959_s28 = smov 8  }
  0x12   :  { %32 = dma.hbm_to_vmem [thread:$0]  %s1237_s0, 1024, %s27_s18, [#allocation4], %s958_s27, %s958_s27, %s959_s28  }
  0x13   :  { %951 = dma.done.wait [#allocation4], 1024  }
  0x14   :  { %952 = vsyncadd [#allocation4], 4294966272  ;;  %vm63_vm0 = vcmask 261120   ;;  %v1034_v0 = vld [vmem:[#allocation3] sm:$0xff]  ;;  %v1036_v1 = vld [vmem:[#allocation3 + $0x10] sm:$0xff]  ;;  %vm362_vm1 = vcmask 130048  }
  0x15   :  { %v1038_v2 = vld [vmem:[#allocation3 + $0x8] sm:$0xff]  ;;  %v64_v3 = vsel %vm63_vm0, %v1034_v0, 0.0  ;;  %v70_v4 = vsel %vm63_vm0, %v1036_v1, 0.0  ;;  %v1044_v5 = vld [vmem:[#allocation3 + $0x18] sm:$0xff]  ;;  %v1048_v7 = vld [vmem:[#allocation3 + $0x20] sm:$0xff]  ;;  %vm495_vm2 = vcmask 64512  }
  0x16   :  { %65 = vadd.xlane.f32.xlu0 %v64_v3  ;;  %71 = vadd.xlane.f32.xlu1 %v70_v4  ;;  %v67_v6 = vsel %vm63_vm0, %v1038_v2, 0.0  ;;  %v73_v8 = vsel %vm63_vm0, %v1044_v5, 0.0  ;;  %v1052_v9 = vld [vmem:[#allocation3 + $0x28] sm:$0xff]  ;;  %v76_v10 = vsel %vm63_vm0, %v1048_v7, 0.0  ;;  %v1058_v12 = vld [vmem:[#allocation3 + $0x30] sm:$0xff]  ;;  %v1060_v13 = vld [vmem:[#allocation3 + $0x38] sm:$0xff] }
  0x17   :  { %v79_v11 = vsel %vm63_vm0, %v1052_v9, 0.0  ;;  %v82_v14 = vsel %vm63_vm0, %v1058_v12, 0.0  ;;  %v85_v15 = vsel %vm63_vm0, %v1060_v13, 0.0  ;;  %v830_v56 = vld [vmem:[%s1241_s4] sm:$0xff]   ;;  %v831_v57 = vld [vmem:[%s1241_s4 + $0x8] sm:$0xff]   ;;  %vm574_vm3 = vcmask 1041409  }
  0x18   :  { %803 = vmatprep.subr.bf16.mxu0 %v830_v56  ;;  %vm576_vm4 = vcmask 1042434   ;;  %vm578_vm5 = vcmask 1043459   ;;  %vm580_vm6 = vcmask 1044484   ;;  %vm582_vm7 = vcmask 1045509  }
  0x19   :  { %804 = vmatpush3.bf16.msra.mxu0 %v830_v56  ;;  %vm584_vm8 = vcmask 1046534   ;;  %vm586_vm9 = vcmask 1047559  }
  0x1a   :  { %68 = vadd.xlane.f32.xlu0 %v67_v6  ;;  %74 = vadd.xlane.f32.xlu1 %v73_v8 }
  0x1b   :  { %805 = vmatprep.subr.bf16.mxu0 %v831_v57 }
  0x1d   :  { %806 = vmatpush3.bf16.msra.mxu0 %v831_v57 }
  0x1e   :  { %77 = vadd.xlane.f32.xlu0 %v76_v10  ;;  %80 = vadd.xlane.f32.xlu1 %v79_v11 }
  0x22   :  { %83 = vadd.xlane.f32.xlu0 %v82_v14  ;;  %86 = vadd.xlane.f32.xlu1 %v85_v15 }
  0xa3   :  { %v66_v16 = vpop.xlane.xlu0 %65  ;;  %v72_v17 = vpop.xlane.xlu1 %71 }
  0xa4   :  { %v89_v18 = vmul.f32 0.03125, %v66_v16  ;;  %v91_v19 = vmul.f32 0.03125, %v72_v17 }
  0xa6   :  { %v1067_v20 = vsub.f32 %v1034_v0, %v89_v18  ;;  %v1070_v21 = vsub.f32 %v1036_v1, %v91_v19 }
  0xa7   :  { %v69_v22 = vpop.xlane.xlu0 %68  ;;  %v75_v23 = vpop.xlane.xlu1 %74 }
  0xa8   :  { %v90_v24 = vmul.f32 0.03125, %v69_v22  ;;  %v92_v25 = vmul.f32 0.03125, %v75_v23  ;;  %v105_v26 = vmul.f32 %v1067_v20, %v1067_v20  ;;  %v107_v27 = vmul.f32 %v1070_v21, %v1070_v21 }
  0xaa   :  { %v1077_v28 = vsub.f32 %v1038_v2, %v90_v24  ;;  %v1080_v29 = vsub.f32 %v1044_v5, %v92_v25  ;;  %v113_v30 = vsel %vm63_vm0, %v105_v26, 0.0  ;;  %v119_v33 = vsel %vm63_vm0, %v107_v27, 0.0 }
  0xab   :  { %114 = vadd.xlane.f32.xlu0 %v113_v30  ;;  %v78_v31 = vpop.xlane.xlu0 %77  ;;  %v81_v32 = vpop.xlane.xlu1 %80 }
  0xac   :  { %v93_v34 = vmul.f32 0.03125, %v78_v31  ;;  %v94_v35 = vmul.f32 0.03125, %v81_v32  ;;  %v106_v36 = vmul.f32 %v1077_v28, %v1077_v28  ;;  %v108_v37 = vmul.f32 %v1080_v29, %v1080_v29  ;;  %v776_v31 = vld [vmem:[%s1239_s2] ss:$0 sm:$0xff] }
  0xae   :  { %v1089_v38 = vsub.f32 %v1048_v7, %v93_v34  ;;  %v1092_v39 = vsub.f32 %v1052_v9, %v94_v35  ;;  %v116_v40 = vsel %vm63_vm0, %v106_v36, 0.0  ;;  %v122_v43 = vsel %vm63_vm0, %v108_v37, 0.0 }
  0xaf   :  { %120 = vadd.xlane.f32.xlu0 %v119_v33  ;;  %117 = vadd.xlane.f32.xlu1 %v116_v40  ;;  %v84_v41 = vpop.xlane.xlu0 %83  ;;  %v87_v42 = vpop.xlane.xlu1 %86 }
  0xb0   :  { %v95_v44 = vmul.f32 0.03125, %v84_v41  ;;  %v96_v45 = vmul.f32 0.03125, %v87_v42  ;;  %v109_v46 = vmul.f32 %v1089_v38, %v1089_v38  ;;  %v110_v47 = vmul.f32 %v1092_v39, %v1092_v39 }
  0xb2   :  { %v1101_v48 = vsub.f32 %v1058_v12, %v95_v44  ;;  %v1104_v49 = vsub.f32 %v1060_v13, %v96_v45  ;;  %v125_v50 = vsel %vm63_vm0, %v109_v46, 0.0  ;;  %v128_v51 = vsel %vm63_vm0, %v110_v47, 0.0 }
  0xb3   :  { %123 = vadd.xlane.f32.xlu1 %v122_v43  ;;  %126 = vadd.xlane.f32.xlu0 %v125_v50 }
  0xb4   :  { %v111_v52 = vmul.f32 %v1101_v48, %v1101_v48  ;;  %v112_v53 = vmul.f32 %v1104_v49, %v1104_v49 }
  0xb6   :  { %v131_v54 = vsel %vm63_vm0, %v111_v52, 0.0  ;;  %v134_v55 = vsel %vm63_vm0, %v112_v53, 0.0 }
  0xb7   :  { %129 = vadd.xlane.f32.xlu1 %v128_v51  ;;  %132 = vadd.xlane.f32.xlu0 %v131_v54 }
  0xbb   :  { %135 = vadd.xlane.f32.xlu1 %v134_v55 }
 0x138   :  { %v115_v58 = vpop.xlane.xlu0 %114 }
 0x139   :  { %v137_v59 = vmul.f32 0.03125, %v115_v58 }
 0x13b   :  { %v145_v60 = vadd.f32 1e-05, %v137_v59 }
 0x13c   :  { %v118_v61 = vpop.xlane.xlu1 %117  ;;  %v121_v62 = vpop.xlane.xlu0 %120 }
 0x13d   :  { %833 = vrsqrt.f32 %v145_v60  ;;  %v138_v63 = vmul.f32 0.03125, %v118_v61  ;;  %v139_v3 = vmul.f32 0.03125, %v121_v62 }
 0x13f   :  { %v146_v4 = vadd.f32 1e-05, %v138_v63  ;;  %v147_v6 = vadd.f32 1e-05, %v139_v3 }
 0x140   :  { %v124_v8 = vpop.xlane.xlu1 %123  ;;  %v127_v10 = vpop.xlane.xlu0 %126 }
 0x141   :  { %835 = vrsqrt.f32 %v146_v4  ;;  %v140_v11 = vmul.f32 0.03125, %v124_v8  ;;  %v141_v14 = vmul.f32 0.03125, %v127_v10 }
 0x142   :  { %837 = vrsqrt.f32 %v147_v6 }
 0x143   :  { %v148_v15 = vadd.f32 1e-05, %v140_v11  ;;  %v149_v16 = vadd.f32 1e-05, %v141_v14 }
 0x144   :  { %v130_v17 = vpop.xlane.xlu1 %129  ;;  %v133_v18 = vpop.xlane.xlu0 %132 }
 0x145   :  { %839 = vrsqrt.f32 %v148_v15  ;;  %v142_v19 = vmul.f32 0.03125, %v130_v17  ;;  %v143_v22 = vmul.f32 0.03125, %v133_v18 }
 0x146   :  { %841 = vrsqrt.f32 %v149_v16 }
 0x147   :  { %v834_v23 = vpop.eup %833  ;;  %v150_v24 = vadd.f32 1e-05, %v142_v19  ;;  %v151_v25 = vadd.f32 1e-05, %v143_v22 }
 0x148   :  { %v136_v26 = vpop.xlane.xlu1 %135  ;;  %v161_v27 = vmul.f32 %v834_v23, %v1067_v20  ;;  %v777_v20 = vld [vmem:[%s1240_s3] ss:$0 sm:$0xff] }
 0x149   :  { %843 = vrsqrt.f32 %v150_v24  ;;  %v144_v30 = vmul.f32 0.03125, %v136_v26 }
 0x14a   :  { %845 = vrsqrt.f32 %v151_v25  ;;  %v176_v36 = vmul.f32 %v776_v31, %v161_v27 }
 0x14b   :  { %v836_v32 = vpop.eup %835  ;;  %v152_v33 = vadd.f32 1e-05, %v144_v30 }
 0x14c   :  { %v838_v34 = vpop.eup %837  ;;  %v162_v35 = vmul.f32 %v836_v32, %v1077_v28  ;;  %v191_v44 = vadd.f32 %v777_v20, %v176_v36 }
 0x14d   :  { %v163_v37 = vmul.f32 %v838_v34, %v1070_v21  ;;  %847 = vrsqrt.f32 %v152_v33 }
 0x14e   :  { %v177_v40 = vmul.f32 %v776_v31, %v162_v35 }
 0x14f   :  { %v840_v41 = vpop.eup %839  ;;  %v178_v46 = vmul.f32 %v776_v31, %v163_v37 }
 0x150   :  { %v842_v42 = vpop.eup %841  ;;  %v164_v43 = vmul.f32 %v840_v41, %v1080_v29  ;;  %v192_v45 = vadd.f32 %v777_v20, %v177_v40 }
 0x151   :  { %v165_v47 = vmul.f32 %v842_v42, %v1089_v38  ;;  %v193_v53 = vadd.f32 %v777_v20, %v178_v46 }
 0x152   :  { %v199_v50 = vpack.c.bf16 %v192_v45, %v191_v44  ;;  %v179_v28 = vmul.f32 %v776_v31, %v164_v43 }
 0x153   :  { %v844_v51 = vpop.eup %843  ;;  %v180_v55 = vmul.f32 %v776_v31, %v165_v47 }
 0x154   :  { %v846_v52 = vpop.eup %845  ;;  %v166_v21 = vmul.f32 %v844_v51, %v1092_v39  ;;  %807 = vmatprep.mubr.msk.bf16.mxu0 %vm63_vm0, %v199_v50  ;;  %v194_v54 = vadd.f32 %v777_v20, %v179_v28 }
 0x155   :  { %v167_v56 = vmul.f32 %v846_v52, %v1101_v48  ;;  %v195_v38 = vadd.f32 %v777_v20, %v180_v55  ;;  %v832_v48 = vld [vmem:[%s1243_s6] sm:$0xff]  }
 0x156   :  { %v200_v57 = vpack.c.bf16 %v194_v54, %v193_v53  ;;  %v181_v29 = vmul.f32 %v776_v31, %v166_v21  ;;  %815 = vmatprep.subr.bf16.mxu1 %v832_v48 }
 0x157   :  { %v848_v58 = vpop.eup %847  ;;  %v182_v61 = vmul.f32 %v776_v31, %v167_v56  ;;  %816 = vmatpush3.bf16.msra.mxu1 %v832_v48 }
 0x158   :  { %v168_v59 = vmul.f32 %v848_v58, %v1104_v49  ;;  %808 = vmatmul.mubr.msk.bf16.vlgmr.msra.gmra.mrb[0].mxu0 %vm63_vm0, %v200_v57  ;;  %v196_v60 = vadd.f32 %v777_v20, %v181_v29  ;;  %v778_v49 = vld [vmem:[%s1242_s5] ss:$0 sm:$0xff] }
 0x159   :  { %v197_v39 = vadd.f32 %v777_v20, %v182_v61 }
 0x15a   :  { %v201_v62 = vpack.c.bf16 %v196_v60, %v195_v38  ;;  %v183_v63 = vmul.f32 %v776_v31, %v168_v59 }
 0x15c   :  { %811 = vmatprep.mubr.msk.bf16.mxu0 %vm63_vm0, %v201_v62  ;;  %v198_v3 = vadd.f32 %v777_v20, %v183_v63 }
 0x15e   :  { %v202_v4 = vpack.c.bf16 %v198_v3, %v197_v39 }
 0x160   :  { %812 = vmatmul.mubr.msk.bf16.gmra.mrb[4].mxu0 %vm63_vm0, %v202_v4 }
 0x22b   :  { %v809_v6 = vpop.f32.mrb[0].mxu0 }
 0x22c   :  { %v281_v8 = vadd.f32 %v809_v6, %v778_v49  ;;  %v272_v10 = vpop.f32.mrb[1].mxu0 }
 0x22d   :  { %v273_v11 = vadd.f32 %v778_v49, %v272_v10  ;;  %v810_v14 = vpop.f32.mrb[2].mxu0 }
 0x22e   :  { %v313_v15 = vmul.f32 0.70710677, %v281_v8  ;;  %v284_v16 = vadd.f32 %v810_v14, %v778_v49  ;;  %v275_v17 = vpop.f32.mrb[3].mxu0  ;;  %v305_v45 = vmul.f32 0.5, %v281_v8  ;;  %v785_v14 = vld [vmem:[%s1244_s7] ss:$0 sm:$0xff] }
 0x22f   :  { %v311_v18 = vmul.f32 0.70710677, %v273_v11  ;;  %v276_v19 = vadd.f32 %v778_v49, %v275_v17  ;;  %v303_v50 = vmul.f32 0.5, %v273_v11 }
 0x230   :  { %849 = verf.f32 %v313_v15  ;;  %v314_v22 = vmul.f32 0.70710677, %v284_v16  ;;  %v306_v46 = vmul.f32 0.5, %v284_v16 }
 0x231   :  { %851 = verf.f32 %v311_v18  ;;  %v312_v23 = vmul.f32 0.70710677, %v276_v19  ;;  %v304_v28 = vmul.f32 0.5, %v276_v19 }
 0x232   :  { %853 = verf.f32 %v314_v22 }
 0x233   :  { %855 = verf.f32 %v312_v23  ;;  %v813_v24 = vpop.f32.mrb[4].mxu0 }
 0x234   :  { %v297_v25 = vadd.f32 %v813_v24, %v778_v49  ;;  %v288_v26 = vpop.f32.mrb[5].mxu0 }
 0x235   :  { %v289_v27 = vadd.f32 %v778_v49, %v288_v26  ;;  %v814_v30 = vpop.f32.mrb[6].mxu0 }
 0x236   :  { %v317_v31 = vmul.f32 0.70710677, %v297_v25  ;;  %v300_v32 = vadd.f32 %v814_v30, %v778_v49  ;;  %v291_v33 = vpop.f32.mrb[7].mxu0  ;;  %v309_v61 = vmul.f32 0.5, %v297_v25 }
 0x237   :  { %v315_v34 = vmul.f32 0.70710677, %v289_v27  ;;  %v292_v35 = vadd.f32 %v778_v49, %v291_v33  ;;  %v307_v39 = vmul.f32 0.5, %v289_v27 }
 0x238   :  { %857 = verf.f32 %v317_v31  ;;  %v318_v36 = vmul.f32 0.70710677, %v300_v32  ;;  %v310_v62 = vmul.f32 0.5, %v300_v32 }
 0x239   :  { %859 = verf.f32 %v315_v34  ;;  %v316_v37 = vmul.f32 0.70710677, %v292_v35  ;;  %v308_v3 = vmul.f32 0.5, %v292_v35 }
 0x23a   :  { %v850_v20 = vpop.eup %849  ;;  %861 = verf.f32 %v318_v36 }
 0x23b   :  { %v852_v40 = vpop.eup %851  ;;  %v329_v41 = vadd.f32 1.0, %v850_v20  ;;  %863 = verf.f32 %v316_v37 }
 0x23c   :  { %v854_v42 = vpop.eup %853  ;;  %v327_v43 = vadd.f32 1.0, %v852_v40 }
 0x23d   :  { %v856_v44 = vpop.eup %855  ;;  %v330_v47 = vadd.f32 1.0, %v854_v42  ;;  %v337_v52 = vmul.f32 %v329_v41, %v305_v45 }
 0x23e   :  { %v328_v51 = vadd.f32 1.0, %v856_v44  ;;  %v335_v53 = vmul.f32 %v327_v43, %v303_v50 }
 0x23f   :  { %v338_v21 = vmul.f32 %v330_v47, %v306_v46 }
 0x240   :  { %v336_v54 = vmul.f32 %v328_v51, %v304_v28 }
 0x241   :  { %v344_v55 = vpack.c.bf16 %v338_v21, %v337_v52  ;;  %v791_v52 = vld [vmem:[%s1245_s8] ss:$0 sm:$0xff] }
 0x242   :  { %v858_v56 = vpop.eup %857  ;;  %v343_v57 = vpack.c.bf16 %v336_v54, %v335_v53 }
 0x243   :  { %v860_v29 = vpop.eup %859  ;;  %v333_v58 = vadd.f32 1.0, %v858_v56 }
 0x244   :  { %v862_v59 = vpop.eup %861  ;;  %v331_v38 = vadd.f32 1.0, %v860_v29  ;;  %817 = vmatprep.mubr.msk.bf16.mxu1 %vm362_vm1, %v343_v57 }
 0x245   :  { %v864_v60 = vpop.eup %863  ;;  %v334_v63 = vadd.f32 1.0, %v862_v59  ;;  %818 = vmatmul.mubr.msk.bf16.vlgmr.msra.gmra.mrb[0].mxu1 %vm362_vm1, %v344_v55  ;;  %v341_v48 = vmul.f32 %v333_v58, %v309_v61 }
 0x246   :  { %v332_v4 = vadd.f32 1.0, %v864_v60  ;;  %v339_v6 = vmul.f32 %v331_v38, %v307_v39 }
 0x247   :  { %v342_v49 = vmul.f32 %v334_v63, %v310_v62 }
 0x248   :  { %v340_v8 = vmul.f32 %v332_v4, %v308_v3 }
 0x249   :  { %v346_v10 = vpack.c.bf16 %v342_v49, %v341_v48 }
 0x24a   :  { %v345_v11 = vpack.c.bf16 %v340_v8, %v339_v6 }
 0x24c   :  { %821 = vmatprep.mubr.msk.bf16.mxu1 %vm362_vm1, %v345_v11 }
 0x24d   :  { %822 = vmatmul.mubr.msk.bf16.gmra.mrb[4].mxu1 %vm362_vm1, %v346_v10 }
 0x318   :  { %v819_v15 = vpop.f32.mrb[0].mxu1 }
 0x319   :  { %v418_v16 = vadd.f32 %v819_v15, %v785_v14  ;;  %v409_v17 = vpop.f32.mrb[1].mxu1 }
 0x31a   :  { %v410_v18 = vadd.f32 %v785_v14, %v409_v17  ;;  %v820_v19 = vpop.f32.mrb[2].mxu1 }
 0x31b   :  { %v450_v22 = vmul.f32 0.70710677, %v418_v16  ;;  %v421_v23 = vadd.f32 %v820_v19, %v785_v14  ;;  %v412_v24 = vpop.f32.mrb[3].mxu1  ;;  %v442_v46 = vmul.f32 0.5, %v418_v16 }
 0x31c   :  { %v448_v25 = vmul.f32 0.70710677, %v410_v18  ;;  %v413_v26 = vadd.f32 %v785_v14, %v412_v24  ;;  %v440_v28 = vmul.f32 0.5, %v410_v18 }
 0x31d   :  { %865 = verf.f32 %v450_v22  ;;  %v451_v27 = vmul.f32 0.70710677, %v421_v23  ;;  %v443_v53 = vmul.f32 0.5, %v421_v23 }
 0x31e   :  { %867 = verf.f32 %v448_v25  ;;  %v449_v30 = vmul.f32 0.70710677, %v413_v26  ;;  %v441_v56 = vmul.f32 0.5, %v413_v26 }
 0x31f   :  { %869 = verf.f32 %v451_v27 }
 0x320   :  { %871 = verf.f32 %v449_v30  ;;  %v823_v31 = vpop.f32.mrb[4].mxu1 }
 0x321   :  { %v434_v32 = vadd.f32 %v823_v31, %v785_v14  ;;  %v425_v33 = vpop.f32.mrb[5].mxu1 }
 0x322   :  { %v426_v34 = vadd.f32 %v785_v14, %v425_v33  ;;  %v824_v35 = vpop.f32.mrb[6].mxu1 }
 0x323   :  { %v454_v36 = vmul.f32 0.70710677, %v434_v32  ;;  %v437_v37 = vadd.f32 %v824_v35, %v785_v14  ;;  %v428_v20 = vpop.f32.mrb[7].mxu1  ;;  %v446_v6 = vmul.f32 0.5, %v434_v32 }
 0x324   :  { %v452_v40 = vmul.f32 0.70710677, %v426_v34  ;;  %v429_v41 = vadd.f32 %v785_v14, %v428_v20  ;;  %v444_v8 = vmul.f32 0.5, %v426_v34 }
 0x325   :  { %873 = verf.f32 %v454_v36  ;;  %v455_v42 = vmul.f32 0.70710677, %v437_v37  ;;  %v447_v14 = vmul.f32 0.5, %v437_v37  ;;  %v540_v36 = vlaneseq }
 0x326   :  { %875 = verf.f32 %v452_v40  ;;  %v453_v43 = vmul.f32 0.70710677, %v429_v41  ;;  %v445_v17 = vmul.f32 0.5, %v429_v41 }
 0x327   :  { %v866_v44 = vpop.eup %865  ;;  %877 = verf.f32 %v455_v42  ;;  %v541_v20 = vand.u32 127, %v540_v36  ;;  %v1162_v40 = vshrl.u32 %v540_v36, 7  ;;  %v521_v42 = vstv %s1246_s9 }
 0x328   :  { %v868_v45 = vpop.eup %867  ;;  %v466_v47 = vadd.f32 1.0, %v866_v44  ;;  %879 = verf.f32 %v453_v43 }
 0x329   :  { %v870_v50 = vpop.eup %869  ;;  %v464_v51 = vadd.f32 1.0, %v868_v45  ;;  %v544_v45 = vsub.s32 %v541_v20, %v1162_v40  ;;  %v654_v36 = vsub.s32 6, %v1162_v40 }
 0x32a   :  { %v872_v21 = vpop.eup %871  ;;  %v467_v54 = vadd.f32 1.0, %v870_v50  ;;  %v474_v55 = vmul.f32 %v466_v47, %v442_v46 }
 0x32b   :  { %v465_v57 = vadd.f32 1.0, %v872_v21  ;;  %v472_v29 = vmul.f32 %v464_v51, %v440_v28 }
 0x32c   :  { %v489_v58 = vmul.f32 %v791_v52, %v474_v55  ;;  %v475_v59 = vmul.f32 %v467_v54, %v443_v53 }
 0x32d   :  { %v473_v38 = vmul.f32 %v465_v57, %v441_v56  ;;  %v487_v62 = vmul.f32 %v791_v52, %v472_v29 }
 0x32e   :  { %v502_v60 = vsel %vm495_vm2, %v489_v58, 0.0  ;;  %v490_v61 = vmul.f32 %v791_v52, %v475_v59 }
 0x32f   :  { %v874_v63 = vpop.eup %873  ;;  %503 = vadd.xlane.f32.xlu0 %v502_v60  ;;  %v488_v48 = vmul.f32 %v791_v52, %v473_v38  ;;  %v496_v16 = vsel %vm495_vm2, %v487_v62, 0.0 }
 0x330   :  { %v876_v39 = vpop.eup %875  ;;  %v470_v3 = vadd.f32 1.0, %v874_v63  ;;  %v505_v4 = vsel %vm495_vm2, %v490_v61, 0.0 }
 0x331   :  { %v878_v49 = vpop.eup %877  ;;  %v468_v10 = vadd.f32 1.0, %v876_v39  ;;  %506 = vadd.xlane.f32.xlu1 %v505_v4  ;;  %v499_v23 = vsel %vm495_vm2, %v488_v48, 0.0 }
 0x332   :  { %v880_v11 = vpop.eup %879  ;;  %v471_v15 = vadd.f32 1.0, %v878_v49  ;;  %v478_v22 = vmul.f32 %v470_v3, %v446_v6  ;;  %v530_v3 = vld [vmem:[%s1238_s1] sm:$0xff]  ;;  %s960_s1 = smov [#allocation7]  }
 0x333   :  { %v469_v18 = vadd.f32 1.0, %v880_v11  ;;  %497 = vadd.xlane.f32.xlu0 %v496_v16  ;;  %v476_v19 = vmul.f32 %v468_v10, %v444_v8  ;;  %vm531_vm10 = vcmp.ne.f32.partialorder %v530_v3, 0.0  ;;  %s763_s23 = sshll.u32 %s960_s1, 4  ;;  %s764_s23 = int_to_ptr.vmem [resolvable:$true] %s763_s23 }
 0x334   :  { %v479_v26 = vmul.f32 %v471_v15, %v447_v14  ;;  %v493_v31 = vmul.f32 %v791_v52, %v478_v22  ;;  %s907_s24 = scalar_lea.vmem %s764_s23, 128  ;;  %p912_p9 = scmp.lt.s32.totalorder %s764_s23, %s764_s23 }
 0x335   :  { %500 = vadd.xlane.f32.xlu1 %v499_v23  ;;  %v491_v24 = vmul.f32 %v791_v52, %v476_v19  ;;  %v477_v25 = vmul.f32 %v469_v18, %v445_v17  ;;  %v619_v23 = vsub.s32 1, %v1162_v40  ;;  %p908_p8 = scmp.ne.s32.totalorder %s764_s23, %s907_s24  ;;  %p913_p10 = scmp.lt.s32.totalorder %s907_s24, %s907_s24 }
 0x336   :  { %v494_v33 = vmul.f32 %v791_v52, %v479_v26  ;;  %v514_v34 = vsel %vm495_vm2, %v493_v31, 0.0  ;;  %v626_v31 = vsub.s32 2, %v1162_v40 }
 0x337   :  { %v508_v27 = vsel %vm495_vm2, %v491_v24, 0.0  ;;  %v492_v30 = vmul.f32 %v791_v52, %v477_v25  ;;  %v612_v24 = vsub.s32 0, %v1162_v40  ;;  %p914_p11 = por %p913_p10, %p912_p9 }
 0x338   :  { %509 = vadd.xlane.f32.xlu0 %v508_v27  ;;  %v517_v35 = vsel %vm495_vm2, %v494_v33, 0.0 }
 0x339   :  { %v511_v32 = vsel %vm495_vm2, %v492_v30, 0.0  ;;  %p915_p12 = pnand %p914_p11, %p908_p8 }
 0x33a   :  { %512 = vadd.xlane.f32.xlu1 %v511_v32  ;;  %v640_v32 = vsub.s32 4, %v1162_v40 }
 0x33c   :  { %515 = vadd.xlane.f32.xlu0 %v514_v34 }
 0x33e   :  { %518 = vadd.xlane.f32.xlu1 %v517_v35  ;;  %v633_v35 = vsub.s32 3, %v1162_v40 }
 0x3bc   :  { %v504_v37 = vpop.xlane.xlu0 %503 }
 0x3bd   :  { %v524_v46 = vadd.f32 %v521_v42, %v504_v37 }
 0x3be   :  { %v507_v41 = vpop.xlane.xlu1 %506 }
 0x3bf   :  { %v525_v50 = vadd.f32 %v521_v42, %v507_v41  ;;  %v553_v53 = vrot.slane %v524_v46, %v544_v45  ;;  %v647_v41 = vsub.s32 5, %v1162_v40 }
 0x3c0   :  { %v498_v43 = vpop.xlane.xlu0 %497 }
 0x3c1   :  { %v522_v44 = vadd.f32 %v521_v42, %v498_v43  ;;  %v557_v55 = vrot.slane %v525_v50, %v544_v45  ;;  %v661_v43 = vsub.s32 7, %v1162_v40 }
 0x3c2   :  { %v501_v47 = vpop.xlane.xlu1 %500 }
 0x3c3   :  { %v523_v28 = vadd.f32 %v521_v42, %v501_v47  ;;  %v545_v51 = vrot.slane %v522_v44, %v544_v45 }
 0x3c5   :  { %v549_v52 = vrot.slane %v523_v28, %v544_v45  ;;  %v510_v21 = vpop.xlane.xlu0 %509 }
 0x3c6   :  { %v526_v54 = vadd.f32 %v521_v42, %v510_v21 }
 0x3c7   :  { %v575_v56 = vsel %vm574_vm3, %v549_v52, %v545_v51  ;;  %v513_v57 = vpop.xlane.xlu1 %512 }
 0x3c8   :  { %v577_v29 = vsel %vm576_vm4, %v553_v53, %v575_v56  ;;  %v561_v58 = vrot.slane %v526_v54, %v544_v45  ;;  %v527_v59 = vadd.f32 %v521_v42, %v513_v57 }
 0x3c9   :  { %v579_v38 = vsel %vm578_vm5, %v557_v55, %v577_v29  ;;  %v516_v60 = vpop.xlane.xlu0 %515 }
 0x3ca   :  { %v581_v61 = vsel %vm580_vm6, %v561_v58, %v579_v38  ;;  %v565_v62 = vrot.slane %v527_v59, %v544_v45  ;;  %v528_v63 = vadd.f32 %v521_v42, %v516_v60 }
 0x3cb   :  { %v519_v39 = vpop.xlane.xlu1 %518 }
 0x3cc   :  { %v569_v4 = vrot.slane %v528_v63, %v544_v45  ;;  %v529_v48 = vadd.f32 %v521_v42, %v519_v39  ;;  %v583_v49 = vsel %vm582_vm7, %v565_v62, %v581_v61 }
 0x3ce   :  { %v573_v6 = vrot.slane %v529_v48, %v544_v45  ;;  %v585_v8 = vsel %vm584_vm8, %v569_v4, %v583_v49 }
 0x3d0   :  { %v587_v10 = vsel %vm586_vm9, %v573_v6, %v585_v8 }
 0x3d1   :  { %v589_v11 = vsel %vm531_vm10, -1e+09, %v587_v10 }
 0x3d2   :  { %v590_v14 = vsel %vm495_vm2, %v589_v11, -inf }
 0x3d3   :  { %591 = vmax.xlane.f32.xlu0 %v590_v14 }
 0x460   :  { %v592_v15 = vpop.xlane.xlu0 %591 }
 0x461   :  { %v593_v16 = vsub.f32 %v589_v11, %v592_v15 }
 0x463   :  { %v594_v17 = vmul.f32 1.442695, %v593_v16 }
 0x465   :  { %881 = vpow2.f32 %v594_v17 }
 0x46f   :  { %v882_v18 = vpop.eup %881 }
 0x470   :  { %v596_v19 = vsel %vm495_vm2, %v882_v18, 0.0 }
 0x471   :  { %597 = vadd.xlane.f32.xlu1 %v596_v19 }
 0x4fe   :  { %v598_v22 = vpop.xlane.xlu1 %597 }
 0x4ff   :  { %883 = vrcp.f32 %v598_v22 }
 0x509   :  { %v884_v25 = vpop.eup %883 }
 0x50a   :  { %v600_v26 = vmul.f32 %v884_v25, %v882_v18 }
 0x50c   :  { %601 = vst.msk [vmem:[#allocation7] sm:$0xff] %vm495_vm2, %v600_v26  ;;  %v620_v27 = vrot.slane %v600_v26, %v619_v23  ;;  %v613_v30 = vrot.slane %v600_v26, %v612_v24  ;;  %v627_v33 = vrot.slane %v600_v26, %v626_v31  ;;  %v641_v34 = vrot.slane %v600_v26, %v640_v32 }
 0x50d   :  { %v634_v37 = vrot.slane %v600_v26, %v633_v35  ;;  %v655_v20 = vrot.slane %v600_v26, %v654_v36  ;;  %v648_v42 = vrot.slane %v600_v26, %v647_v41  ;;  %v662_v44 = vrot.slane %v600_v26, %v661_v43 }
 0x50e   :  { %622 = vbcast.lane.b32.xlu1 %v620_v27, 256  ;;  %615 = vbcast.lane.b32.xlu0 %v613_v30, 256 }
 0x512   :  { %629 = vbcast.lane.b32.xlu1 %v627_v33, 256  ;;  %643 = vbcast.lane.b32.xlu0 %v641_v34, 256 }
 0x516   :  { %636 = vbcast.lane.b32.xlu1 %v634_v37, 256  ;;  %657 = vbcast.lane.b32.xlu0 %v655_v20, 256 }
 0x51a   :  { %650 = vbcast.lane.b32.xlu1 %v648_v42, 256 }
 0x51e   :  { %664 = vbcast.lane.b32.xlu1 %v662_v44, 256 }
 0x51f   :  { %918 = shalt.err (!%p915_p12)
}
 0x520   :  { %s919_s27 = scalar_lea.hbm %s1248_s11, 128 }
 0x521   :  { %p920_p13 = scmp.ne.s32.totalorder %s1248_s11, %s919_s27  ;;  %p923_p0 = scmp.lt.u32.totalorder %s919_s27, %s1248_s11 }
 0x523   :  { %p925_p1 = pnand %p923_p0, %p920_p13 }
 0x525   :  { %928 = shalt.err (!%p925_p1)
}
 0x526   :  { %766 = dma.vmem_to_hbm [thread:$0]  %s764_s23, 128, %s1248_s11, [#allocation8]  }
 0x527   :  { %s961_s11 = smov [#allocation6]  }
 0x528   :  { %s753_s14 = sshll.u32 %s961_s11, 4  ;;  %s754_s14 = int_to_ptr.vmem [resolvable:$true] %s753_s14 }
 0x529   :  { %s929_s4 = scalar_lea.vmem %s754_s14, 128  ;;  %p934_p3 = scmp.lt.s32.totalorder %s754_s14, %s754_s14 }
 0x52a   :  { %p930_p2 = scmp.ne.s32.totalorder %s754_s14, %s929_s4  ;;  %p935_p4 = scmp.lt.s32.totalorder %s929_s4, %s929_s4 }
 0x52c   :  { %p936_p5 = por %p935_p4, %p934_p3 }
 0x52e   :  { %p937_p6 = pnand %p936_p5, %p930_p2 }
 0x580   :  { %v623_v40 = vpop.permute.xlu1 %622  ;;  %v616_v45 = vpop.permute.xlu0 %615 }
 0x581   :  { %v667_v46 = vmul.f32 %v623_v40, %v1038_v2  ;;  %v666_v47 = vmul.f32 %v616_v45, %v1034_v0 }
 0x583   :  { %v681_v50 = vsel %vm63_vm0, %v667_v46, 0.0  ;;  %v674_v28 = vsel %vm63_vm0, %v666_v47, 0.0 }
 0x584   :  { %v682_v51 = vrot.slane %v681_v50, 4  ;;  %v675_v52 = vrot.slane %v674_v28, 4  ;;  %v630_v21 = vpop.permute.xlu1 %629  ;;  %v644_v53 = vpop.permute.xlu0 %643 }
 0x585   :  { %v668_v54 = vmul.f32 %v630_v21, %v1036_v1  ;;  %v670_v55 = vmul.f32 %v644_v53, %v1048_v7 }
 0x586   :  { %v683_v56 = vadd.f32 %v682_v51, %v681_v50  ;;  %v676_v57 = vadd.f32 %v675_v52, %v674_v28 }
 0x587   :  { %v688_v29 = vsel %vm63_vm0, %v668_v54, 0.0  ;;  %v702_v2 = vsel %vm63_vm0, %v670_v55, 0.0 }
 0x588   :  { %v684_v58 = vrot.slane %v683_v56, 2  ;;  %v677_v0 = vrot.slane %v676_v57, 2  ;;  %v689_v59 = vrot.slane %v688_v29, 4  ;;  %v703_v38 = vrot.slane %v702_v2, 4  ;;  %v637_v60 = vpop.permute.xlu1 %636  ;;  %v658_v61 = vpop.permute.xlu0 %657 }
 0x589   :  { %v669_v62 = vmul.f32 %v637_v60, %v1044_v5  ;;  %v672_v63 = vmul.f32 %v658_v61, %v1058_v12 }
 0x58a   :  { %v685_v39 = vadd.f32 %v684_v58, %v683_v56  ;;  %v690_v1 = vadd.f32 %v689_v59, %v688_v29  ;;  %v704_v3 = vadd.f32 %v703_v38, %v702_v2  ;;  %v678_v7 = vadd.f32 %v677_v0, %v676_v57 }
 0x58b   :  { %v695_v4 = vsel %vm63_vm0, %v669_v62, 0.0  ;;  %v716_v48 = vsel %vm63_vm0, %v672_v63, 0.0 }
 0x58c   :  { %v691_v49 = vrot.slane %v690_v1, 2  ;;  %v651_v6 = vpop.permute.xlu1 %650  ;;  %v705_v8 = vrot.slane %v704_v3, 2  ;;  %v696_v10 = vrot.slane %v695_v4, 4  ;;  %v717_v11 = vrot.slane %v716_v48, 4 }
 0x58d   :  { %v671_v14 = vmul.f32 %v651_v6, %v1052_v9  ;;  %v686_v15 = vrot.slane %v685_v39, 1  ;;  %v679_v5 = vrot.slane %v678_v7, 1 }
 0x58e   :  { %v692_v16 = vadd.f32 %v691_v49, %v690_v1  ;;  %v697_v17 = vadd.f32 %v696_v10, %v695_v4  ;;  %v718_v12 = vadd.f32 %v717_v11, %v716_v48  ;;  %v706_v24 = vadd.f32 %v705_v8, %v704_v3 }
 0x58f   :  { %v709_v18 = vsel %vm63_vm0, %v671_v14, 0.0  ;;  %v687_v31 = vadd.f32 %v686_v15, %v685_v39  ;;  %v680_v32 = vadd.f32 %v679_v5, %v678_v7 }
 0x590   :  { %v693_v19 = vrot.slane %v692_v16, 1  ;;  %v710_v22 = vrot.slane %v709_v18, 4  ;;  %v665_v23 = vpop.permute.xlu1 %664  ;;  %v698_v25 = vrot.slane %v697_v17, 2  ;;  %v719_v26 = vrot.slane %v718_v12, 2 }
 0x591   :  { %v673_v27 = vmul.f32 %v665_v23, %v1060_v13  ;;  %v707_v37 = vrot.slane %v706_v24, 1  ;;  %v738_v44 = vsel %vm574_vm3, %v687_v31, %v680_v32 }
 0x592   :  { %v711_v30 = vadd.f32 %v710_v22, %v709_v18  ;;  %v699_v33 = vadd.f32 %v698_v25, %v697_v17  ;;  %v694_v34 = vadd.f32 %v693_v19, %v692_v16  ;;  %v720_v41 = vadd.f32 %v719_v26, %v718_v12 }
 0x593   :  { %v723_v9 = vsel %vm63_vm0, %v673_v27, 0.0  ;;  %v708_v47 = vadd.f32 %v707_v37, %v706_v24 }
 0x594   :  { %v712_v35 = vrot.slane %v711_v30, 2  ;;  %v724_v36 = vrot.slane %v723_v9, 4  ;;  %v700_v20 = vrot.slane %v699_v33, 1  ;;  %v739_v45 = vsel %vm576_vm4, %v694_v34, %v738_v44 }
 0x595   :  { %v721_v28 = vrot.slane %v720_v41, 1 }
 0x596   :  { %v713_v42 = vadd.f32 %v712_v35, %v711_v30  ;;  %v725_v43 = vadd.f32 %v724_v36, %v723_v9  ;;  %v701_v40 = vadd.f32 %v700_v20, %v699_v33 }
 0x597   :  { %v722_v55 = vadd.f32 %v721_v28, %v720_v41 }
 0x598   :  { %v714_v13 = vrot.slane %v713_v42, 1  ;;  %v726_v46 = vrot.slane %v725_v43, 2  ;;  %v740_v50 = vsel %vm578_vm5, %v701_v40, %v739_v45 }
 0x599   :  { %v741_v21 = vsel %vm580_vm6, %v708_v47, %v740_v50 }
 0x59a   :  { %v715_v51 = vadd.f32 %v714_v13, %v713_v42  ;;  %v727_v52 = vadd.f32 %v726_v46, %v725_v43 }
 0x59c   :  { %v728_v53 = vrot.slane %v727_v52, 1  ;;  %v742_v54 = vsel %vm582_vm7, %v715_v51, %v741_v21 }
 0x59d   :  { %v743_v57 = vsel %vm584_vm8, %v722_v55, %v742_v54 }
 0x59e   :  { %v729_v56 = vadd.f32 %v728_v53, %v727_v52 }
 0x5a0   :  { %v744_v29 = vsel %vm586_vm9, %v729_v56, %v743_v57 }
 0x5a1   :  { %746 = vst.msk [vmem:[#allocation6] sm:$0xff] %vm63_vm0, %v744_v29 }
 0x5a2   :  { %940 = shalt.err (!%p937_p6)
}
 0x5a3   :  { %s941_s17 = scalar_lea.hbm %s1247_s10, 128 }
 0x5a4   :  { %p942_p7 = scmp.ne.s32.totalorder %s1247_s10, %s941_s17  ;;  %p945_p8 = scmp.lt.u32.totalorder %s941_s17, %s1247_s10 }
 0x5a6   :  { %p947_p9 = pnand %p945_p8, %p942_p7 }
 0x5a8   :  { %950 = shalt.err (!%p947_p9)
}
 0x5a9   :  { %756 = dma.vmem_to_hbm [thread:$0]  %s754_s14, 128, %s1247_s10, [#allocation5]  }
 0x5aa   :  { %953 = dma.done.wait [#allocation5], 128  }
 0x5ab   :  { %954 = vsyncadd [#allocation5], 4294967168 }
 0x5ac   :  { %955 = dma.done.wait [#allocation8], 128  }
 0x5ad   :  { %956 = vsyncadd [#allocation8], 4294967168 }
 0x5ae   :  { %773 = vsyncpa [#allocation4], 1 }
 0x5af   :  { %774 = vsyncpa [#allocation5], 1 }
 0x5b0   :  { %775 = vsyncpa [#allocation8], 1 }

// kernel: tpu_custom_call.1
= control target key start
LH: loop header
LB: loop body
LE: loop exit
PB: predicated region body
PF: predicated region fallthrough
CT: control target
= control target key end

     0   :  { %18 = vsyncpa [#allocation4], 0  ;;  %s1237_s0 = inlined_call_operand.hbm [shape: f32[8,8,32], index: 0, kind: input, shape index: {}]   ;;  %s1238_s1 = inlined_call_operand.vmem [shape: f32[8,8], index: 1, kind: input, shape index: {}]   ;;  %s1239_s2 = inlined_call_operand.vmem [shape: f32[1,32], index: 2, kind: input, shape index: {}]   ;;  %s1240_s3 = inlined_call_operand.vmem [shape: f32[1,32], index: 3, kind: input, shape index: {}]   ;;  %s1241_s4 = inlined_call_operand.vmem [shape: bf16[32,16], index: 4, kind: input, shape index: {}]   ;;  %s1242_s5 = inlined_call_operand.vmem [shape: f32[1,16], index: 5, kind: input, shape index: {}]   ;;  %s1243_s6 = inlined_call_operand.vmem [shape: bf16[16,8], index: 6, kind: input, shape index: {}]   ;;  %s1244_s7 = inlined_call_operand.vmem [shape: f32[1,8], index: 7, kind: input, shape index: {}]   ;;  %s1245_s8 = inlined_call_operand.vmem [shape: f32[1,8], index: 8, kind: input, shape index: {}]   ;;  %s1246_s9 = inlined_call_operand.<no memory space> [shape: f32[1], index: 9, kind: input, shape index: {}]   ;;  %s1247_s10 = inlined_call_operand.hbm [shape: f32[8,32], index: 10, kind: output, shape index: {0}]   ;;  %s1248_s11 = inlined_call_operand.hbm [shape: f32[8,8], index: 11, kind: output, shape index: {1}]  }
   0x1   :  { %19 = vsyncpa [#allocation5], 0 }
   0x2   :  { %20 = vsyncpa [#allocation8], 0  ;;  %s957_s17 = smov [#allocation3]   ;;  %s885_s21 = scalar_lea.hbm %s1237_s0, 1024 }
   0x3   :  { %s26_s18 = sshll.u32 %s957_s17, 4  ;;  %p886_p0 = scmp.ne.s32.totalorder %s1237_s0, %s885_s21  ;;  %s27_s18 = int_to_ptr.vmem [resolvable:$true] %s26_s18 }
   0x4   :  { %p889_p1 = scmp.lt.u32.totalorder %s885_s21, %s1237_s0 }
   0x6   :  { %p891_p2 = pnand %p889_p1, %p886_p0 }
   0x8   :  { %894 = shalt.err (!%p891_p2)
}
   0x9   :  { %s895_s26 = scalar_lea.vmem %s27_s18, 1024  ;;  %p900_p4 = scmp.lt.s32.totalorder %s27_s18, %s27_s18 }
   0xa   :  { %p896_p3 = scmp.ne.s32.totalorder %s27_s18, %s895_s26  ;;  %p901_p5 = scmp.lt.s32.totalorder %s895_s26, %s895_s26 }
   0xc   :  { %p902_p6 = por %p901_p5, %p900_p4 }
   0xe   :  { %p903_p7 = pnand %p902_p6, %p896_p3 }
  0x10   :  { %906 = shalt.err (!%p903_p7)
}
  0x11   :  { %s958_s27 = smov 128   ;;  %s959_s28 = smov 8  }
  0x12   :  { %32 = dma.hbm_to_vmem [thread:$0]  %s1237_s0, 1024, %s27_s18, [#allocation4], %s958_s27, %s958_s27, %s959_s28  }
  0x13   :  { %951 = dma.done.wait [#allocation4], 1024  }
  0x14   :  { %952 = vsyncadd [#allocation4], 4294966272  ;;  %vm63_vm0 = vcmask 261120   ;;  %v1034_v0 = vld [vmem:[#allocation3] sm:$0xff]  ;;  %v1036_v1 = vld [vmem:[#allocation3 + $0x10] sm:$0xff]  ;;  %vm362_vm1 = vcmask 130048  }
  0x15   :  { %v1038_v2 = vld [vmem:[#allocation3 + $0x8] sm:$0xff]  ;;  %v64_v3 = vsel %vm63_vm0, %v1034_v0, 0.0  ;;  %v70_v4 = vsel %vm63_vm0, %v1036_v1, 0.0  ;;  %v1044_v5 = vld [vmem:[#allocation3 + $0x18] sm:$0xff]  ;;  %v1048_v7 = vld [vmem:[#allocation3 + $0x20] sm:$0xff]  ;;  %vm495_vm2 = vcmask 64512  }
  0x16   :  { %65 = vadd.xlane.f32.xlu0 %v64_v3  ;;  %71 = vadd.xlane.f32.xlu1 %v70_v4  ;;  %v67_v6 = vsel %vm63_vm0, %v1038_v2, 0.0  ;;  %v73_v8 = vsel %vm63_vm0, %v1044_v5, 0.0  ;;  %v1052_v9 = vld [vmem:[#allocation3 + $0x28] sm:$0xff]  ;;  %v76_v10 = vsel %vm63_vm0, %v1048_v7, 0.0  ;;  %v1058_v12 = vld [vmem:[#allocation3 + $0x30] sm:$0xff]  ;;  %v1060_v13 = vld [vmem:[#allocation3 + $0x38] sm:$0xff] }
  0x17   :  { %v79_v11 = vsel %vm63_vm0, %v1052_v9, 0.0  ;;  %v82_v14 = vsel %vm63_vm0, %v1058_v12, 0.0  ;;  %v85_v15 = vsel %vm63_vm0, %v1060_v13, 0.0  ;;  %v830_v56 = vld [vmem:[%s1241_s4] sm:$0xff]   ;;  %v831_v57 = vld [vmem:[%s1241_s4 + $0x8] sm:$0xff]   ;;  %vm574_vm3 = vcmask 1041409  }
  0x18   :  { %803 = vmatprep.subr.bf16.mxu0 %v830_v56  ;;  %vm576_vm4 = vcmask 1042434   ;;  %vm578_vm5 = vcmask 1043459   ;;  %vm580_vm6 = vcmask 1044484   ;;  %vm582_vm7 = vcmask 1045509  }
  0x19   :  { %804 = vmatpush3.bf16.msra.mxu0 %v830_v56  ;;  %vm584_vm8 = vcmask 1046534   ;;  %vm586_vm9 = vcmask 1047559  }
  0x1a   :  { %68 = vadd.xlane.f32.xlu0 %v67_v6  ;;  %74 = vadd.xlane.f32.xlu1 %v73_v8 }
  0x1b   :  { %805 = vmatprep.subr.bf16.mxu0 %v831_v57 }
  0x1d   :  { %806 = vmatpush3.bf16.msra.mxu0 %v831_v57 }
  0x1e   :  { %77 = vadd.xlane.f32.xlu0 %v76_v10  ;;  %80 = vadd.xlane.f32.xlu1 %v79_v11 }
  0x22   :  { %83 = vadd.xlane.f32.xlu0 %v82_v14  ;;  %86 = vadd.xlane.f32.xlu1 %v85_v15 }
  0xa3   :  { %v66_v16 = vpop.xlane.xlu0 %65  ;;  %v72_v17 = vpop.xlane.xlu1 %71 }
  0xa4   :  { %v89_v18 = vmul.f32 0.03125, %v66_v16  ;;  %v91_v19 = vmul.f32 0.03125, %v72_v17 }
  0xa6   :  { %v1067_v20 = vsub.f32 %v1034_v0, %v89_v18  ;;  %v1070_v21 = vsub.f32 %v1036_v1, %v91_v19 }
  0xa7   :  { %v69_v22 = vpop.xlane.xlu0 %68  ;;  %v75_v23 = vpop.xlane.xlu1 %74 }
  0xa8   :  { %v90_v24 = vmul.f32 0.03125, %v69_v22  ;;  %v92_v25 = vmul.f32 0.03125, %v75_v23  ;;  %v105_v26 = vmul.f32 %v1067_v20, %v1067_v20  ;;  %v107_v27 = vmul.f32 %v1070_v21, %v1070_v21 }
  0xaa   :  { %v1077_v28 = vsub.f32 %v1038_v2, %v90_v24  ;;  %v1080_v29 = vsub.f32 %v1044_v5, %v92_v25  ;;  %v113_v30 = vsel %vm63_vm0, %v105_v26, 0.0  ;;  %v119_v33 = vsel %vm63_vm0, %v107_v27, 0.0 }
  0xab   :  { %114 = vadd.xlane.f32.xlu0 %v113_v30  ;;  %v78_v31 = vpop.xlane.xlu0 %77  ;;  %v81_v32 = vpop.xlane.xlu1 %80 }
  0xac   :  { %v93_v34 = vmul.f32 0.03125, %v78_v31  ;;  %v94_v35 = vmul.f32 0.03125, %v81_v32  ;;  %v106_v36 = vmul.f32 %v1077_v28, %v1077_v28  ;;  %v108_v37 = vmul.f32 %v1080_v29, %v1080_v29  ;;  %v776_v31 = vld [vmem:[%s1239_s2] ss:$0 sm:$0xff] }
  0xae   :  { %v1089_v38 = vsub.f32 %v1048_v7, %v93_v34  ;;  %v1092_v39 = vsub.f32 %v1052_v9, %v94_v35  ;;  %v116_v40 = vsel %vm63_vm0, %v106_v36, 0.0  ;;  %v122_v43 = vsel %vm63_vm0, %v108_v37, 0.0 }
  0xaf   :  { %120 = vadd.xlane.f32.xlu0 %v119_v33  ;;  %117 = vadd.xlane.f32.xlu1 %v116_v40  ;;  %v84_v41 = vpop.xlane.xlu0 %83  ;;  %v87_v42 = vpop.xlane.xlu1 %86 }
  0xb0   :  { %v95_v44 = vmul.f32 0.03125, %v84_v41  ;;  %v96_v45 = vmul.f32 0.03125, %v87_v42  ;;  %v109_v46 = vmul.f32 %v1089_v38, %v1089_v38  ;;  %v110_v47 = vmul.f32 %v1092_v39, %v1092_v39 }
  0xb2   :  { %v1101_v48 = vsub.f32 %v1058_v12, %v95_v44  ;;  %v1104_v49 = vsub.f32 %v1060_v13, %v96_v45  ;;  %v125_v50 = vsel %vm63_vm0, %v109_v46, 0.0  ;;  %v128_v51 = vsel %vm63_vm0, %v110_v47, 0.0 }
  0xb3   :  { %123 = vadd.xlane.f32.xlu1 %v122_v43  ;;  %126 = vadd.xlane.f32.xlu0 %v125_v50 }
  0xb4   :  { %v111_v52 = vmul.f32 %v1101_v48, %v1101_v48  ;;  %v112_v53 = vmul.f32 %v1104_v49, %v1104_v49 }
  0xb6   :  { %v131_v54 = vsel %vm63_vm0, %v111_v52, 0.0  ;;  %v134_v55 = vsel %vm63_vm0, %v112_v53, 0.0 }
  0xb7   :  { %129 = vadd.xlane.f32.xlu1 %v128_v51  ;;  %132 = vadd.xlane.f32.xlu0 %v131_v54 }
  0xbb   :  { %135 = vadd.xlane.f32.xlu1 %v134_v55 }
 0x138   :  { %v115_v58 = vpop.xlane.xlu0 %114 }
 0x139   :  { %v137_v59 = vmul.f32 0.03125, %v115_v58 }
 0x13b   :  { %v145_v60 = vadd.f32 1e-05, %v137_v59 }
 0x13c   :  { %v118_v61 = vpop.xlane.xlu1 %117  ;;  %v121_v62 = vpop.xlane.xlu0 %120 }
 0x13d   :  { %833 = vrsqrt.f32 %v145_v60  ;;  %v138_v63 = vmul.f32 0.03125, %v118_v61  ;;  %v139_v3 = vmul.f32 0.03125, %v121_v62 }
 0x13f   :  { %v146_v4 = vadd.f32 1e-05, %v138_v63  ;;  %v147_v6 = vadd.f32 1e-05, %v139_v3 }
 0x140   :  { %v124_v8 = vpop.xlane.xlu1 %123  ;;  %v127_v10 = vpop.xlane.xlu0 %126 }
 0x141   :  { %835 = vrsqrt.f32 %v146_v4  ;;  %v140_v11 = vmul.f32 0.03125, %v124_v8  ;;  %v141_v14 = vmul.f32 0.03125, %v127_v10 }
 0x142   :  { %837 = vrsqrt.f32 %v147_v6 }
 0x143   :  { %v148_v15 = vadd.f32 1e-05, %v140_v11  ;;  %v149_v16 = vadd.f32 1e-05, %v141_v14 }
 0x144   :  { %v130_v17 = vpop.xlane.xlu1 %129  ;;  %v133_v18 = vpop.xlane.xlu0 %132 }
 0x145   :  { %839 = vrsqrt.f32 %v148_v15  ;;  %v142_v19 = vmul.f32 0.03125, %v130_v17  ;;  %v143_v22 = vmul.f32 0.03125, %v133_v18 }
 0x146   :  { %841 = vrsqrt.f32 %v149_v16 }
 0x147   :  { %v834_v23 = vpop.eup %833  ;;  %v150_v24 = vadd.f32 1e-05, %v142_v19  ;;  %v151_v25 = vadd.f32 1e-05, %v143_v22 }
 0x148   :  { %v136_v26 = vpop.xlane.xlu1 %135  ;;  %v161_v27 = vmul.f32 %v834_v23, %v1067_v20  ;;  %v777_v20 = vld [vmem:[%s1240_s3] ss:$0 sm:$0xff] }
 0x149   :  { %843 = vrsqrt.f32 %v150_v24  ;;  %v144_v30 = vmul.f32 0.03125, %v136_v26 }
 0x14a   :  { %845 = vrsqrt.f32 %v151_v25  ;;  %v176_v36 = vmul.f32 %v776_v31, %v161_v27 }
 0x14b   :  { %v836_v32 = vpop.eup %835  ;;  %v152_v33 = vadd.f32 1e-05, %v144_v30 }
 0x14c   :  { %v838_v34 = vpop.eup %837  ;;  %v162_v35 = vmul.f32 %v836_v32, %v1077_v28  ;;  %v191_v44 = vadd.f32 %v777_v20, %v176_v36 }
 0x14d   :  { %v163_v37 = vmul.f32 %v838_v34, %v1070_v21  ;;  %847 = vrsqrt.f32 %v152_v33 }
 0x14e   :  { %v177_v40 = vmul.f32 %v776_v31, %v162_v35 }
 0x14f   :  { %v840_v41 = vpop.eup %839  ;;  %v178_v46 = vmul.f32 %v776_v31, %v163_v37 }
 0x150   :  { %v842_v42 = vpop.eup %841  ;;  %v164_v43 = vmul.f32 %v840_v41, %v1080_v29  ;;  %v192_v45 = vadd.f32 %v777_v20, %v177_v40 }
 0x151   :  { %v165_v47 = vmul.f32 %v842_v42, %v1089_v38  ;;  %v193_v53 = vadd.f32 %v777_v20, %v178_v46 }
 0x152   :  { %v199_v50 = vpack.c.bf16 %v192_v45, %v191_v44  ;;  %v179_v28 = vmul.f32 %v776_v31, %v164_v43 }
 0x153   :  { %v844_v51 = vpop.eup %843  ;;  %v180_v55 = vmul.f32 %v776_v31, %v165_v47 }
 0x154   :  { %v846_v52 = vpop.eup %845  ;;  %v166_v21 = vmul.f32 %v844_v51, %v1092_v39  ;;  %807 = vmatprep.mubr.msk.bf16.mxu0 %vm63_vm0, %v199_v50  ;;  %v194_v54 = vadd.f32 %v777_v20, %v179_v28 }
 0x155   :  { %v167_v56 = vmul.f32 %v846_v52, %v1101_v48  ;;  %v195_v38 = vadd.f32 %v777_v20, %v180_v55  ;;  %v832_v48 = vld [vmem:[%s1243_s6] sm:$0xff]  }
 0x156   :  { %v200_v57 = vpack.c.bf16 %v194_v54, %v193_v53  ;;  %v181_v29 = vmul.f32 %v776_v31, %v166_v21  ;;  %815 = vmatprep.subr.bf16.mxu1 %v832_v48 }
 0x157   :  { %v848_v58 = vpop.eup %847  ;;  %v182_v61 = vmul.f32 %v776_v31, %v167_v56  ;;  %816 = vmatpush3.bf16.msra.mxu1 %v832_v48 }
 0x158   :  { %v168_v59 = vmul.f32 %v848_v58, %v1104_v49  ;;  %808 = vmatmul.mubr.msk.bf16.vlgmr.msra.gmra.mrb[0].mxu0 %vm63_vm0, %v200_v57  ;;  %v196_v60 = vadd.f32 %v777_v20, %v181_v29  ;;  %v778_v49 = vld [vmem:[%s1242_s5] ss:$0 sm:$0xff] }
 0x159   :  { %v197_v39 = vadd.f32 %v777_v20, %v182_v61 }
 0x15a   :  { %v201_v62 = vpack.c.bf16 %v196_v60, %v195_v38  ;;  %v183_v63 = vmul.f32 %v776_v31, %v168_v59 }
 0x15c   :  { %811 = vmatprep.mubr.msk.bf16.mxu0 %vm63_vm0, %v201_v62  ;;  %v198_v3 = vadd.f32 %v777_v20, %v183_v63 }
 0x15e   :  { %v202_v4 = vpack.c.bf16 %v198_v3, %v197_v39 }
 0x160   :  { %812 = vmatmul.mubr.msk.bf16.gmra.mrb[4].mxu0 %vm63_vm0, %v202_v4 }
 0x22b   :  { %v809_v6 = vpop.f32.mrb[0].mxu0 }
 0x22c   :  { %v281_v8 = vadd.f32 %v809_v6, %v778_v49  ;;  %v272_v10 = vpop.f32.mrb[1].mxu0 }
 0x22d   :  { %v273_v11 = vadd.f32 %v778_v49, %v272_v10  ;;  %v810_v14 = vpop.f32.mrb[2].mxu0 }
 0x22e   :  { %v313_v15 = vmul.f32 0.70710677, %v281_v8  ;;  %v284_v16 = vadd.f32 %v810_v14, %v778_v49  ;;  %v275_v17 = vpop.f32.mrb[3].mxu0  ;;  %v305_v45 = vmul.f32 0.5, %v281_v8  ;;  %v785_v14 = vld [vmem:[%s1244_s7] ss:$0 sm:$0xff] }
 0x22f   :  { %v311_v18 = vmul.f32 0.70710677, %v273_v11  ;;  %v276_v19 = vadd.f32 %v778_v49, %v275_v17  ;;  %v303_v50 = vmul.f32 0.5, %v273_v11 }
 0x230   :  { %849 = verf.f32 %v313_v15  ;;  %v314_v22 = vmul.f32 0.70710677, %v284_v16  ;;  %v306_v46 = vmul.f32 0.5, %v284_v16 }
 0x231   :  { %851 = verf.f32 %v311_v18  ;;  %v312_v23 = vmul.f32 0.70710677, %v276_v19  ;;  %v304_v28 = vmul.f32 0.5, %v276_v19 }
 0x232   :  { %853 = verf.f32 %v314_v22 }
 0x233   :  { %855 = verf.f32 %v312_v23  ;;  %v813_v24 = vpop.f32.mrb[4].mxu0 }
 0x234   :  { %v297_v25 = vadd.f32 %v813_v24, %v778_v49  ;;  %v288_v26 = vpop.f32.mrb[5].mxu0 }
 0x235   :  { %v289_v27 = vadd.f32 %v778_v49, %v288_v26  ;;  %v814_v30 = vpop.f32.mrb[6].mxu0 }
 0x236   :  { %v317_v31 = vmul.f32 0.70710677, %v297_v25  ;;  %v300_v32 = vadd.f32 %v814_v30, %v778_v49  ;;  %v291_v33 = vpop.f32.mrb[7].mxu0  ;;  %v309_v61 = vmul.f32 0.5, %v297_v25 }
 0x237   :  { %v315_v34 = vmul.f32 0.70710677, %v289_v27  ;;  %v292_v35 = vadd.f32 %v778_v49, %v291_v33  ;;  %v307_v39 = vmul.f32 0.5, %v289_v27 }
 0x238   :  { %857 = verf.f32 %v317_v31  ;;  %v318_v36 = vmul.f32 0.70710677, %v300_v32  ;;  %v310_v62 = vmul.f32 0.5, %v300_v32 }
 0x239   :  { %859 = verf.f32 %v315_v34  ;;  %v316_v37 = vmul.f32 0.70710677, %v292_v35  ;;  %v308_v3 = vmul.f32 0.5, %v292_v35 }
 0x23a   :  { %v850_v20 = vpop.eup %849  ;;  %861 = verf.f32 %v318_v36 }
 0x23b   :  { %v852_v40 = vpop.eup %851  ;;  %v329_v41 = vadd.f32 1.0, %v850_v20  ;;  %863 = verf.f32 %v316_v37 }
 0x23c   :  { %v854_v42 = vpop.eup %853  ;;  %v327_v43 = vadd.f32 1.0, %v852_v40 }
 0x23d   :  { %v856_v44 = vpop.eup %855  ;;  %v330_v47 = vadd.f32 1.0, %v854_v42  ;;  %v337_v52 = vmul.f32 %v329_v41, %v305_v45 }
 0x23e   :  { %v328_v51 = vadd.f32 1.0, %v856_v44  ;;  %v335_v53 = vmul.f32 %v327_v43, %v303_v50 }
 0x23f   :  { %v338_v21 = vmul.f32 %v330_v47, %v306_v46 }
 0x240   :  { %v336_v54 = vmul.f32 %v328_v51, %v304_v28 }
 0x241   :  { %v344_v55 = vpack.c.bf16 %v338_v21, %v337_v52  ;;  %v791_v52 = vld [vmem:[%s1245_s8] ss:$0 sm:$0xff] }
 0x242   :  { %v858_v56 = vpop.eup %857  ;;  %v343_v57 = vpack.c.bf16 %v336_v54, %v335_v53 }
 0x243   :  { %v860_v29 = vpop.eup %859  ;;  %v333_v58 = vadd.f32 1.0, %v858_v56 }
 0x244   :  { %v862_v59 = vpop.eup %861  ;;  %v331_v38 = vadd.f32 1.0, %v860_v29  ;;  %817 = vmatprep.mubr.msk.bf16.mxu1 %vm362_vm1, %v343_v57 }
 0x245   :  { %v864_v60 = vpop.eup %863  ;;  %v334_v63 = vadd.f32 1.0, %v862_v59  ;;  %818 = vmatmul.mubr.msk.bf16.vlgmr.msra.gmra.mrb[0].mxu1 %vm362_vm1, %v344_v55  ;;  %v341_v48 = vmul.f32 %v333_v58, %v309_v61 }
 0x246   :  { %v332_v4 = vadd.f32 1.0, %v864_v60  ;;  %v339_v6 = vmul.f32 %v331_v38, %v307_v39 }
 0x247   :  { %v342_v49 = vmul.f32 %v334_v63, %v310_v62 }
 0x248   :  { %v340_v8 = vmul.f32 %v332_v4, %v308_v3 }
 0x249   :  { %v346_v10 = vpack.c.bf16 %v342_v49, %v341_v48 }
 0x24a   :  { %v345_v11 = vpack.c.bf16 %v340_v8, %v339_v6 }
 0x24c   :  { %821 = vmatprep.mubr.msk.bf16.mxu1 %vm362_vm1, %v345_v11 }
 0x24d   :  { %822 = vmatmul.mubr.msk.bf16.gmra.mrb[4].mxu1 %vm362_vm1, %v346_v10 }
 0x318   :  { %v819_v15 = vpop.f32.mrb[0].mxu1 }
 0x319   :  { %v418_v16 = vadd.f32 %v819_v15, %v785_v14  ;;  %v409_v17 = vpop.f32.mrb[1].mxu1 }
 0x31a   :  { %v410_v18 = vadd.f32 %v785_v14, %v409_v17  ;;  %v820_v19 = vpop.f32.mrb[2].mxu1 }
 0x31b   :  { %v450_v22 = vmul.f32 0.70710677, %v418_v16  ;;  %v421_v23 = vadd.f32 %v820_v19, %v785_v14  ;;  %v412_v24 = vpop.f32.mrb[3].mxu1  ;;  %v442_v46 = vmul.f32 0.5, %v418_v16 }
 0x31c   :  { %v448_v25 = vmul.f32 0.70710677, %v410_v18  ;;  %v413_v26 = vadd.f32 %v785_v14, %v412_v24  ;;  %v440_v28 = vmul.f32 0.5, %v410_v18 }
 0x31d   :  { %865 = verf.f32 %v450_v22  ;;  %v451_v27 = vmul.f32 0.70710677, %v421_v23  ;;  %v443_v53 = vmul.f32 0.5, %v421_v23 }
 0x31e   :  { %867 = verf.f32 %v448_v25  ;;  %v449_v30 = vmul.f32 0.70710677, %v413_v26  ;;  %v441_v56 = vmul.f32 0.5, %v413_v26 }
 0x31f   :  { %869 = verf.f32 %v451_v27 }
 0x320   :  { %871 = verf.f32 %v449_v30  ;;  %v823_v31 = vpop.f32.mrb[4].mxu1 }
 0x321   :  { %v434_v32 = vadd.f32 %v823_v31, %v785_v14  ;;  %v425_v33 = vpop.f32.mrb[5].mxu1 }
 0x322   :  { %v426_v34 = vadd.f32 %v785_v14, %v425_v33  ;;  %v824_v35 = vpop.f32.mrb[6].mxu1 }
 0x323   :  { %v454_v36 = vmul.f32 0.70710677, %v434_v32  ;;  %v437_v37 = vadd.f32 %v824_v35, %v785_v14  ;;  %v428_v20 = vpop.f32.mrb[7].mxu1  ;;  %v446_v6 = vmul.f32 0.5, %v434_v32 }
 0x324   :  { %v452_v40 = vmul.f32 0.70710677, %v426_v34  ;;  %v429_v41 = vadd.f32 %v785_v14, %v428_v20  ;;  %v444_v8 = vmul.f32 0.5, %v426_v34 }
 0x325   :  { %873 = verf.f32 %v454_v36  ;;  %v455_v42 = vmul.f32 0.70710677, %v437_v37  ;;  %v447_v14 = vmul.f32 0.5, %v437_v37  ;;  %v540_v36 = vlaneseq }
 0x326   :  { %875 = verf.f32 %v452_v40  ;;  %v453_v43 = vmul.f32 0.70710677, %v429_v41  ;;  %v445_v17 = vmul.f32 0.5, %v429_v41 }
 0x327   :  { %v866_v44 = vpop.eup %865  ;;  %877 = verf.f32 %v455_v42  ;;  %v541_v20 = vand.u32 127, %v540_v36  ;;  %v1162_v40 = vshrl.u32 %v540_v36, 7  ;;  %v521_v42 = vstv %s1246_s9 }
 0x328   :  { %v868_v45 = vpop.eup %867  ;;  %v466_v47 = vadd.f32 1.0, %v866_v44  ;;  %879 = verf.f32 %v453_v43 }
 0x329   :  { %v870_v50 = vpop.eup %869  ;;  %v464_v51 = vadd.f32 1.0, %v868_v45  ;;  %v544_v45 = vsub.s32 %v541_v20, %v1162_v40  ;;  %v654_v36 = vsub.s32 6, %v1162_v40 }
 0x32a   :  { %v872_v21 = vpop.eup %871  ;;  %v467_v54 = vadd.f32 1.0, %v870_v50  ;;  %v474_v55 = vmul.f32 %v466_v47, %v442_v46 }
 0x32b   :  { %v465_v57 = vadd.f32 1.0, %v872_v21  ;;  %v472_v29 = vmul.f32 %v464_v51, %v440_v28 }
 0x32c   :  { %v489_v58 = vmul.f32 %v791_v52, %v474_v55  ;;  %v475_v59 = vmul.f32 %v467_v54, %v443_v53 }
 0x32d   :  { %v473_v38 = vmul.f32 %v465_v57, %v441_v56  ;;  %v487_v62 = vmul.f32 %v791_v52, %v472_v29 }
 0x32e   :  { %v502_v60 = vsel %vm495_vm2, %v489_v58, 0.0  ;;  %v490_v61 = vmul.f32 %v791_v52, %v475_v59 }
 0x32f   :  { %v874_v63 = vpop.eup %873  ;;  %503 = vadd.xlane.f32.xlu0 %v502_v60  ;;  %v488_v48 = vmul.f32 %v791_v52, %v473_v38  ;;  %v496_v16 = vsel %vm495_vm2, %v487_v62, 0.0 }
 0x330   :  { %v876_v39 = vpop.eup %875  ;;  %v470_v3 = vadd.f32 1.0, %v874_v63  ;;  %v505_v4 = vsel %vm495_vm2, %v490_v61, 0.0 }
 0x331   :  { %v878_v49 = vpop.eup %877  ;;  %v468_v10 = vadd.f32 1.0, %v876_v39  ;;  %506 = vadd.xlane.f32.xlu1 %v505_v4  ;;  %v499_v23 = vsel %vm495_vm2, %v488_v48, 0.0 }
 0x332   :  { %v880_v11 = vpop.eup %879  ;;  %v471_v15 = vadd.f32 1.0, %v878_v49  ;;  %v478_v22 = vmul.f32 %v470_v3, %v446_v6  ;;  %v530_v3 = vld [vmem:[%s1238_s1] sm:$0xff]  ;;  %s960_s1 = smov [#allocation7]  }
 0x333   :  { %v469_v18 = vadd.f32 1.0, %v880_v11  ;;  %497 = vadd.xlane.f32.xlu0 %v496_v16  ;;  %v476_v19 = vmul.f32 %v468_v10, %v444_v8  ;;  %vm531_vm10 = vcmp.ne.f32.partialorder %v530_v3, 0.0  ;;  %s763_s23 = sshll.u32 %s960_s1, 4  ;;  %s764_s23 = int_to_ptr.vmem [resolvable:$true] %s763_s23 }
 0x334   :  { %v479_v26 = vmul.f32 %v471_v15, %v447_v14  ;;  %v493_v31 = vmul.f32 %v791_v52, %v478_v22  ;;  %s907_s24 = scalar_lea.vmem %s764_s23, 128  ;;  %p912_p9 = scmp.lt.s32.totalorder %s764_s23, %s764_s23 }
 0x335   :  { %500 = vadd.xlane.f32.xlu1 %v499_v23  ;;  %v491_v24 = vmul.f32 %v791_v52, %v476_v19  ;;  %v477_v25 = vmul.f32 %v469_v18, %v445_v17  ;;  %v619_v23 = vsub.s32 1, %v1162_v40  ;;  %p908_p8 = scmp.ne.s32.totalorder %s764_s23, %s907_s24  ;;  %p913_p10 = scmp.lt.s32.totalorder %s907_s24, %s907_s24 }
 0x336   :  { %v494_v33 = vmul.f32 %v791_v52, %v479_v26  ;;  %v514_v34 = vsel %vm495_vm2, %v493_v31, 0.0  ;;  %v626_v31 = vsub.s32 2, %v1162_v40 }
 0x337   :  { %v508_v27 = vsel %vm495_vm2, %v491_v24, 0.0  ;;  %v492_v30 = vmul.f32 %v791_v52, %v477_v25  ;;  %v612_v24 = vsub.s32 0, %v1162_v40  ;;  %p914_p11 = por %p913_p10, %p912_p9 }
 0x338   :  { %509 = vadd.xlane.f32.xlu0 %v508_v27  ;;  %v517_v35 = vsel %vm495_vm2, %v494_v33, 0.0 }
 0x339   :  { %v511_v32 = vsel %vm495_vm2, %v492_v30, 0.0  ;;  %p915_p12 = pnand %p914_p11, %p908_p8 }
 0x33a   :  { %512 = vadd.xlane.f32.xlu1 %v511_v32  ;;  %v640_v32 = vsub.s32 4, %v1162_v40 }
 0x33c   :  { %515 = vadd.xlane.f32.xlu0 %v514_v34 }
 0x33e   :  { %518 = vadd.xlane.f32.xlu1 %v517_v35  ;;  %v633_v35 = vsub.s32 3, %v1162_v40 }
 0x3bc   :  { %v504_v37 = vpop.xlane.xlu0 %503 }
 0x3bd   :  { %v524_v46 = vadd.f32 %v521_v42, %v504_v37 }
 0x3be   :  { %v507_v41 = vpop.xlane.xlu1 %506 }
 0x3bf   :  { %v525_v50 = vadd.f32 %v521_v42, %v507_v41  ;;  %v553_v53 = vrot.slane %v524_v46, %v544_v45  ;;  %v647_v41 = vsub.s32 5, %v1162_v40 }
 0x3c0   :  { %v498_v43 = vpop.xlane.xlu0 %497 }
 0x3c1   :  { %v522_v44 = vadd.f32 %v521_v42, %v498_v43  ;;  %v557_v55 = vrot.slane %v525_v50, %v544_v45  ;;  %v661_v43 = vsub.s32 7, %v1162_v40 }
 0x3c2   :  { %v501_v47 = vpop.xlane.xlu1 %500 }
 0x3c3   :  { %v523_v28 = vadd.f32 %v521_v42, %v501_v47  ;;  %v545_v51 = vrot.slane %v522_v44, %v544_v45 }
 0x3c5   :  { %v549_v52 = vrot.slane %v523_v28, %v544_v45  ;;  %v510_v21 = vpop.xlane.xlu0 %509 }
 0x3c6   :  { %v526_v54 = vadd.f32 %v521_v42, %v510_v21 }
 0x3c7   :  { %v575_v56 = vsel %vm574_vm3, %v549_v52, %v545_v51  ;;  %v513_v57 = vpop.xlane.xlu1 %512 }
 0x3c8   :  { %v577_v29 = vsel %vm576_vm4, %v553_v53, %v575_v56  ;;  %v561_v58 = vrot.slane %v526_v54, %v544_v45  ;;  %v527_v59 = vadd.f32 %v521_v42, %v513_v57 }
 0x3c9   :  { %v579_v38 = vsel %vm578_vm5, %v557_v55, %v577_v29  ;;  %v516_v60 = vpop.xlane.xlu0 %515 }
 0x3ca   :  { %v581_v61 = vsel %vm580_vm6, %v561_v58, %v579_v38  ;;  %v565_v62 = vrot.slane %v527_v59, %v544_v45  ;;  %v528_v63 = vadd.f32 %v521_v42, %v516_v60 }
 0x3cb   :  { %v519_v39 = vpop.xlane.xlu1 %518 }
 0x3cc   :  { %v569_v4 = vrot.slane %v528_v63, %v544_v45  ;;  %v529_v48 = vadd.f32 %v521_v42, %v519_v39  ;;  %v583_v49 = vsel %vm582_vm7, %v565_v62, %v581_v61 }
 0x3ce   :  { %v573_v6 = vrot.slane %v529_v48, %v544_v45  ;;  %v585_v8 = vsel %vm584_vm8, %v569_v4, %v583_v49 }
 0x3d0   :  { %v587_v10 = vsel %vm586_vm9, %v573_v6, %v585_v8 }
 0x3d1   :  { %v589_v11 = vsel %vm531_vm10, -1e+09, %v587_v10 }
 0x3d2   :  { %v590_v14 = vsel %vm495_vm2, %v589_v11, -inf }
 0x3d3   :  { %591 = vmax.xlane.f32.xlu0 %v590_v14 }
 0x460   :  { %v592_v15 = vpop.xlane.xlu0 %591 }
 0x461   :  { %v593_v16 = vsub.f32 %v589_v11, %v592_v15 }
 0x463   :  { %v594_v17 = vmul.f32 1.442695, %v593_v16 }
 0x465   :  { %881 = vpow2.f32 %v594_v17 }
 0x46f   :  { %v882_v18 = vpop.eup %881 }
 0x470   :  { %v596_v19 = vsel %vm495_vm2, %v882_v18, 0.0 }
 0x471   :  { %597 = vadd.xlane.f32.xlu1 %v596_v19 }
 0x4fe   :  { %v598_v22 = vpop.xlane.xlu1 %597 }
 0x4ff   :  { %883 = vrcp.f32 %v598_v22 }
 0x509   :  { %v884_v25 = vpop.eup %883 }
 0x50a   :  { %v600_v26 = vmul.f32 %v884_v25, %v882_v18 }
 0x50c   :  { %601 = vst.msk [vmem:[#allocation7] sm:$0xff] %vm495_vm2, %v600_v26  ;;  %v620_v27 = vrot.slane %v600_v26, %v619_v23  ;;  %v613_v30 = vrot.slane %v600_v26, %v612_v24  ;;  %v627_v33 = vrot.slane %v600_v26, %v626_v31  ;;  %v641_v34 = vrot.slane %v600_v26, %v640_v32 }
 0x50d   :  { %v634_v37 = vrot.slane %v600_v26, %v633_v35  ;;  %v655_v20 = vrot.slane %v600_v26, %v654_v36  ;;  %v648_v42 = vrot.slane %v600_v26, %v647_v41  ;;  %v662_v44 = vrot.slane %v600_v26, %v661_v43 }
 0x50e   :  { %622 = vbcast.lane.b32.xlu1 %v620_v27, 256  ;;  %615 = vbcast.lane.b32.xlu0 %v613_v30, 256 }
 0x512   :  { %629 = vbcast.lane.b32.xlu1 %v627_v33, 256  ;;  %643 = vbcast.lane.b32.xlu0 %v641_v34, 256 }
 0x516   :  { %636 = vbcast.lane.b32.xlu1 %v634_v37, 256  ;;  %657 = vbcast.lane.b32.xlu0 %v655_v20, 256 }
 0x51a   :  { %650 = vbcast.lane.b32.xlu1 %v648_v42, 256 }
 0x51e   :  { %664 = vbcast.lane.b32.xlu1 %v662_v44, 256 }
 0x51f   :  { %918 = shalt.err (!%p915_p12)
}
 0x520   :  { %s919_s27 = scalar_lea.hbm %s1248_s11, 128 }
 0x521   :  { %p920_p13 = scmp.ne.s32.totalorder %s1248_s11, %s919_s27  ;;  %p923_p0 = scmp.lt.u32.totalorder %s919_s27, %s1248_s11 }
 0x523   :  { %p925_p1 = pnand %p923_p0, %p920_p13 }
 0x525   :  { %928 = shalt.err (!%p925_p1)
}
 0x526   :  { %766 = dma.vmem_to_hbm [thread:$0]  %s764_s23, 128, %s1248_s11, [#allocation8]  }
 0x527   :  { %s961_s11 = smov [#allocation6]  }
 0x528   :  { %s753_s14 = sshll.u32 %s961_s11, 4  ;;  %s754_s14 = int_to_ptr.vmem [resolvable:$true] %s753_s14 }
 0x529   :  { %s929_s4 = scalar_lea.vmem %s754_s14, 128  ;;  %p934_p3 = scmp.lt.s32.totalorder %s754_s14, %s754_s14 }
 0x52a   :  { %p930_p2 = scmp.ne.s32.totalorder %s754_s14, %s929_s4  ;;  %p935_p4 = scmp.lt.s32.totalorder %s929_s4, %s929_s4 }
 0x52c   :  { %p936_p5 = por %p935_p4, %p934_p3 }
 0x52e   :  { %p937_p6 = pnand %p936_p5, %p930_p2 }
 0x580   :  { %v623_v40 = vpop.permute.xlu1 %622  ;;  %v616_v45 = vpop.permute.xlu0 %615 }
 0x581   :  { %v667_v46 = vmul.f32 %v623_v40, %v1038_v2  ;;  %v666_v47 = vmul.f32 %v616_v45, %v1034_v0 }
 0x583   :  { %v681_v50 = vsel %vm63_vm0, %v667_v46, 0.0  ;;  %v674_v28 = vsel %vm63_vm0, %v666_v47, 0.0 }
 0x584   :  { %v682_v51 = vrot.slane %v681_v50, 4  ;;  %v675_v52 = vrot.slane %v674_v28, 4  ;;  %v630_v21 = vpop.permute.xlu1 %629  ;;  %v644_v53 = vpop.permute.xlu0 %643 }
 0x585   :  { %v668_v54 = vmul.f32 %v630_v21, %v1036_v1  ;;  %v670_v55 = vmul.f32 %v644_v53, %v1048_v7 }
 0x586   :  { %v683_v56 = vadd.f32 %v682_v51, %v681_v50  ;;  %v676_v57 = vadd.f32 %v675_v52, %v674_v28 }
 0x587   :  { %v688_v29 = vsel %vm63_vm0, %v668_v54, 0.0  ;;  %v702_v2 = vsel %vm63_vm0, %v670_v55, 0.0 }
 0x588   :  { %v684_v58 = vrot.slane %v683_v56, 2  ;;  %v677_v0 = vrot.slane %v676_v57, 2  ;;  %v689_v59 = vrot.slane %v688_v29, 4  ;;  %v703_v38 = vrot.slane %v702_v2, 4  ;;  %v637_v60 = vpop.permute.xlu1 %636  ;;  %v658_v61 = vpop.permute.xlu0 %657 }
 0x589   :  { %v669_v62 = vmul.f32 %v637_v60, %v1044_v5  ;;  %v672_v63 = vmul.f32 %v658_v61, %v1058_v12 }
 0x58a   :  { %v685_v39 = vadd.f32 %v684_v58, %v683_v56  ;;  %v690_v1 = vadd.f32 %v689_v59, %v688_v29  ;;  %v704_v3 = vadd.f32 %v703_v38, %v702_v2  ;;  %v678_v7 = vadd.f32 %v677_v0, %v676_v57 }
 0x58b   :  { %v695_v4 = vsel %vm63_vm0, %v669_v62, 0.0  ;;  %v716_v48 = vsel %vm63_vm0, %v672_v63, 0.0 }
 0x58c   :  { %v691_v49 = vrot.slane %v690_v1, 2  ;;  %v651_v6 = vpop.permute.xlu1 %650  ;;  %v705_v8 = vrot.slane %v704_v3, 2  ;;  %v696_v10 = vrot.slane %v695_v4, 4  ;;  %v717_v11 = vrot.slane %v716_v48, 4 }
 0x58d   :  { %v671_v14 = vmul.f32 %v651_v6, %v1052_v9  ;;  %v686_v15 = vrot.slane %v685_v39, 1  ;;  %v679_v5 = vrot.slane %v678_v7, 1 }
 0x58e   :  { %v692_v16 = vadd.f32 %v691_v49, %v690_v1  ;;  %v697_v17 = vadd.f32 %v696_v10, %v695_v4  ;;  %v718_v12 = vadd.f32 %v717_v11, %v716_v48  ;;  %v706_v24 = vadd.f32 %v705_v8, %v704_v3 }
 0x58f   :  { %v709_v18 = vsel %vm63_vm0, %v671_v14, 0.0  ;;  %v687_v31 = vadd.f32 %v686_v15, %v685_v39  ;;  %v680_v32 = vadd.f32 %v679_v5, %v678_v7 }
 0x590   :  { %v693_v19 = vrot.slane %v692_v16, 1  ;;  %v710_v22 = vrot.slane %v709_v18, 4  ;;  %v665_v23 = vpop.permute.xlu1 %664  ;;  %v698_v25 = vrot.slane %v697_v17, 2  ;;  %v719_v26 = vrot.slane %v718_v12, 2 }
 0x591   :  { %v673_v27 = vmul.f32 %v665_v23, %v1060_v13  ;;  %v707_v37 = vrot.slane %v706_v24, 1  ;;  %v738_v44 = vsel %vm574_vm3, %v687_v31, %v680_v32 }
 0x592   :  { %v711_v30 = vadd.f32 %v710_v22, %v709_v18  ;;  %v699_v33 = vadd.f32 %v698_v25, %v697_v17  ;;  %v694_v34 = vadd.f32 %v693_v19, %v692_v16  ;;  %v720_v41 = vadd.f32 %v719_v26, %v718_v12 }
 0x593   :  { %v723_v9 = vsel %vm63_vm0, %v673_v27, 0.0  ;;  %v708_v47 = vadd.f32 %v707_v37, %v706_v24 }
 0x594   :  { %v712_v35 = vrot.slane %v711_v30, 2  ;;  %v724_v36 = vrot.slane %v723_v9, 4  ;;  %v700_v20 = vrot.slane %v699_v33, 1  ;;  %v739_v45 = vsel %vm576_vm4, %v694_v34, %v738_v44 }
 0x595   :  { %v721_v28 = vrot.slane %v720_v41, 1 }
 0x596   :  { %v713_v42 = vadd.f32 %v712_v35, %v711_v30  ;;  %v725_v43 = vadd.f32 %v724_v36, %v723_v9  ;;  %v701_v40 = vadd.f32 %v700_v20, %v699_v33 }
 0x597   :  { %v722_v55 = vadd.f32 %v721_v28, %v720_v41 }
 0x598   :  { %v714_v13 = vrot.slane %v713_v42, 1  ;;  %v726_v46 = vrot.slane %v725_v43, 2  ;;  %v740_v50 = vsel %vm578_vm5, %v701_v40, %v739_v45 }
 0x599   :  { %v741_v21 = vsel %vm580_vm6, %v708_v47, %v740_v50 }
 0x59a   :  { %v715_v51 = vadd.f32 %v714_v13, %v713_v42  ;;  %v727_v52 = vadd.f32 %v726_v46, %v725_v43 }
 0x59c   :  { %v728_v53 = vrot.slane %v727_v52, 1  ;;  %v742_v54 = vsel %vm582_vm7, %v715_v51, %v741_v21 }
 0x59d   :  { %v743_v57 = vsel %vm584_vm8, %v722_v55, %v742_v54 }
 0x59e   :  { %v729_v56 = vadd.f32 %v728_v53, %v727_v52 }
 0x5a0   :  { %v744_v29 = vsel %vm586_vm9, %v729_v56, %v743_v57 }
 0x5a1   :  { %746 = vst.msk [vmem:[#allocation6] sm:$0xff] %vm63_vm0, %v744_v29 }
 0x5a2   :  { %940 = shalt.err (!%p937_p6)
}
 0x5a3   :  { %s941_s17 = scalar_lea.hbm %s1247_s10, 128 }
 0x5a4   :  { %p942_p7 = scmp.ne.s32.totalorder %s1247_s10, %s941_s17  ;;  %p945_p8 = scmp.lt.u32.totalorder %s941_s17, %s1247_s10 }
 0x5a6   :  { %p947_p9 = pnand %p945_p8, %p942_p7 }
 0x5a8   :  { %950 = shalt.err (!%p947_p9)
}
 0x5a9   :  { %756 = dma.vmem_to_hbm [thread:$0]  %s754_s14, 128, %s1247_s10, [#allocation5]  }
 0x5aa   :  { %953 = dma.done.wait [#allocation5], 128  }
 0x5ab   :  { %954 = vsyncadd [#allocation5], 4294967168 }
 0x5ac   :  { %955 = dma.done.wait [#allocation8], 128  }
 0x5ad   :  { %956 = vsyncadd [#allocation8], 4294967168 }
 0x5ae   :  { %773 = vsyncpa [#allocation4], 1 }
 0x5af   :  { %774 = vsyncpa [#allocation5], 1 }
 0x5b0   :  { %775 = vsyncpa [#allocation8], 1 }

</bundles_post_ra>
